<compile_context>
chip_gen: v7x
topology: tpu7x:2x2x1
jax: 0.10.0
libtpu: 0.0.40
codegen_flags: <defaults>
</compile_context>

<pallas_src>
import functools
from functools import lru_cache

import numpy as np

import jax
import jax.numpy as jnp
from jax import lax
from jax.experimental import pallas as pl
from jax.experimental.pallas import tpu as pltpu

PACK = 128  # packed head-output row width (lane-dense store)


def _round_up(x, m):
    return -(-x // m) * m


# ---------------------------------------------------------------------------
# Static selectors: built once per (H, W, b_tile) with numpy at trace time and
# fed to the kernel as constant-index inputs (zero in-kernel VALU cost).
# ---------------------------------------------------------------------------
@lru_cache(maxsize=None)
def _static_selectors(H, W, n_img):
    HW = H * W
    L_full = n_img * HW
    Ho, Wo = H // 2, W // 2
    L_half = _round_up(n_img * Ho * Wo, 128)

    def conv_masks(h, w, lanes):
        hw = h * w
        pos = np.arange(lanes)
        img_valid = pos < n_img * hw          # pad lanes (half-res only) -> 0
        q = pos % hw
        hh, ww = q // w, q % w
        masks = []
        for oh in (-1, 0, 1):
            for ow in (-1, 0, 1):
                v = ((hh + oh >= 0) & (hh + oh < h) &
                     (ww + ow >= 0) & (ww + ow < w) & img_valid)
                masks.append(v.astype(np.float32))
        return np.stack(masks)                # (9, lanes)

    mask_full = conv_masks(H, W, L_full)
    mask_half = conv_masks(Ho, Wo, L_half)

    # stride-2 selection matrix: dst lane (per-image block of Ho*Wo) <- even src
    sel = np.zeros((L_full, L_half), np.float32)
    for i in range(n_img):
        for dh in range(Ho):
            for dw in range(Wo):
                sel[i * HW + 2 * dh * W + 2 * dw,
                    i * Ho * Wo + dh * Wo + dw] = 1.0

    # per-image average-pool matrix
    pool = np.zeros((n_img, L_half), np.float32)
    inv = 1.0 / float(Ho * Wo)
    for i in range(n_img):
        pool[i, i * Ho * Wo:(i + 1) * Ho * Wo] = inv

    return (jnp.asarray(mask_full), jnp.asarray(mask_half),
            jnp.asarray(sel), jnp.asarray(pool))


# ---------------------------------------------------------------------------
# The single fused kernel: backbone + avgpool + FCs + BNNecks
# ---------------------------------------------------------------------------
def _baseline_fused_kernel(x_ref, mf_ref, mh_ref, sel_ref, pool_ref,
                           ws_ref, ss_ref, wd_ref, sd_ref,
                           wr1_ref, sr1_ref, wr2_ref, sr2_ref,
                           wh_ref, bh_ref, out_ref, *, W, Wo):
    mf = mf_ref[...]                      # (9, L_full) precomputed tap masks
    mh = mh_ref[...]                      # (9, L_half)

    def conv3x3(a, masks, w_ref, s_ref, row_stride, residual=None):
        """3x3 SAME conv (stride 1) + folded-BN shift [+res] + ReLU.

        a: (Cin, L) channels-first; masks: (9, L) static validity masks;
        w_ref: (Cout, 9*Cin) tap-fused weights (BN scale folded in);
        s_ref: (Cout, 1) remaining BN shift.  One deep-K MXU matmul per layer.
        """
        L = a.shape[1]
        taps = []
        t = 0
        for oh in (-1, 0, 1):
            for ow in (-1, 0, 1):
                d = oh * row_stride + ow
                # shifted[p] == a[p + d]; circular wrap only reaches lanes the
                # static mask zeroes (per-image-local masks).
                src = a if d == 0 else pltpu.roll(a, (-d) % L, axis=1)
                taps.append(src * masks[t:t + 1])
                t += 1
        stacked = jnp.concatenate(taps, axis=0)            # (9*Cin, L)
        acc = jnp.dot(w_ref[...], stacked,
                      preferred_element_type=jnp.float32)  # (Cout, L)
        acc = acc + s_ref[...]
        if residual is not None:
            acc = acc + residual
        return jnp.maximum(acc, 0.0)

    # ---- backbone: stem -> strided down-conv -> residual block -----------
    a = x_ref[0]                                           # (Cin, L_full)
    a = conv3x3(a, mf, ws_ref, ss_ref, W)                  # stem
    a = conv3x3(a, mf, wd_ref, sd_ref, W)                  # down conv, full res
    a = jnp.dot(a, sel_ref[...],
                preferred_element_type=jnp.float32)        # stride-2 pick (MXU)
    r = a                                                  # identity skip
    a = conv3x3(a, mh, wr1_ref, sr1_ref, Wo)
    a = conv3x3(a, mh, wr2_ref, sr2_ref, Wo, residual=r)

    # ---- global average pool (precomputed pool matrix) + folded head -----
    feat = lax.dot_general(pool_ref[...], a, (((1,), (1,)), ((), ())),
                           preferred_element_type=jnp.float32)  # (b_tile, C2)
    # packed row = [embed_1 | logits | zero pad] -> one 128-wide store / image
    out_ref[0] = (jnp.dot(feat, wh_ref[...],
                          preferred_element_type=jnp.float32) + bh_ref[...])


# ---------------------------------------------------------------------------
# Wrapper: one pallas_call for the whole forward pass
# ---------------------------------------------------------------------------
def baseline_forward(params, imgs_nchw, labs, *, embed_dim=32, num_classes=16,
                     b_tile=None):
    B, C_in, H, W = imgs_nchw.shape
    assert H % 2 == 0 and W % 2 == 0, (H, W)
    if b_tile is None:
        # keep >=2 grid steps when possible so both v7x TensorCores get work;
        # for larger B this lane-batches B/2 images per step.
        b_tile = B // 2 if (B % 2 == 0 and B >= 2) else 1
    assert B % b_tile == 0
    n_steps = B // b_tile
    HW = H * W
    L_full = b_tile * HW
    assert L_full % 128 == 0, (b_tile, HW)
    Ho, Wo = H // 2, W // 2
    L_half = _round_up(b_tile * Ho * Wo, 128)

    mask_full, mask_half, sel, pool = _static_selectors(H, W, b_tile)

    cin_p = params["w_stem"].shape[1] // 9
    c1 = params["w_stem"].shape[0]
    c2 = params["w_down"].shape[0]
    pack = params["w_head"].shape[1]
    assert embed_dim + num_classes <= pack

    # NCHW -> (n_steps, C, b_tile*HW): images occupy contiguous lane blocks.
    x = imgs_nchw.astype(jnp.float32).reshape(n_steps, b_tile, C_in, HW)
    x = jnp.transpose(x, (0, 2, 1, 3)).reshape(n_steps, C_in, L_full)
    if cin_p != C_in:
        x = jnp.pad(x, ((0, 0), (0, cin_p - C_in), (0, 0)))

    kernel = functools.partial(_baseline_fused_kernel, W=W, Wo=Wo)
    packed = pl.pallas_call(
        kernel,
        out_shape=jax.ShapeDtypeStruct((n_steps, b_tile, pack), jnp.float32),
        grid=(n_steps,),
        in_specs=[
            pl.BlockSpec((1, cin_p, L_full), lambda b: (b, 0, 0)),   # images
            pl.BlockSpec((9, L_full), lambda b: (0, 0)),             # masks full
            pl.BlockSpec((9, L_half), lambda b: (0, 0)),             # masks half
            pl.BlockSpec((L_full, L_half), lambda b: (0, 0)),        # stride-2 sel
            pl.BlockSpec((b_tile, L_half), lambda b: (0, 0)),        # pool matrix
            pl.BlockSpec((c1, 9 * cin_p), lambda b: (0, 0)),         # stem W
            pl.BlockSpec((c1, 1), lambda b: (0, 0)),                 # stem shift
            pl.BlockSpec((c2, 9 * c1), lambda b: (0, 0)),            # down W
            pl.BlockSpec((c2, 1), lambda b: (0, 0)),
            pl.BlockSpec((c2, 9 * c2), lambda b: (0, 0)),            # res1 W
            pl.BlockSpec((c2, 1), lambda b: (0, 0)),
            pl.BlockSpec((c2, 9 * c2), lambda b: (0, 0)),            # res2 W
            pl.BlockSpec((c2, 1), lambda b: (0, 0)),
            pl.BlockSpec((c2, pack), lambda b: (0, 0)),              # folded head W
            pl.BlockSpec((1, pack), lambda b: (0, 0)),               # folded head b
        ],
        out_specs=pl.BlockSpec((1, b_tile, pack), lambda b: (b, 0, 0)),
        compiler_params=pltpu.CompilerParams(
            dimension_semantics=("parallel",)),
    )(x, mask_full, mask_half, sel, pool,
      params["w_stem"], params["s_stem"],
      params["w_down"], params["s_down"],
      params["w_res1"], params["s_res1"],
      params["w_res2"], params["s_res2"],
      params["w_head"], params["b_head"])

    packed = packed.reshape(B, pack)
    embed_1 = packed[:, :embed_dim][:, :, None]                     # (B, E, 1)
    logits = packed[:, embed_dim:embed_dim + num_classes][:, :, None]
    embed = embed_1

    return {
        "training_feat": {
            "triplet": {"embeddings": embed_1, "labels": labs},
            "softmax": {"logits": logits, "labels": labs},
        },
        "visual_summary": {"image": imgs_nchw},
        "inference_feat": {"embeddings": embed, "logits": logits, "labels": labs},
    }


# ---------------------------------------------------------------------------
# Deterministic parameters (xavier weights, eval-mode BN folded in)
# ---------------------------------------------------------------------------
def _xavier_uniform(key, shape, fan_in, fan_out):
    bound = (6.0 / (fan_in + fan_out)) ** 0.5
    return jax.random.uniform(key, shape, jnp.float32, -bound, bound)


def build_params(key, *, c_in=3, c1=16, c2=32, embed_dim=32, num_classes=16,
                 pack=PACK, eps=1e-5):
    assert embed_dim + num_classes <= pack, (embed_dim, num_classes, pack)
    ks = jax.random.split(key, 11)

    def conv_bn(kw, kg, cin, cout):
        # torch OIHW conv weight, xavier-uniform, bias-free; BN2d eval stats.
        return dict(
            w=_xavier_uniform(kw, (cout, cin, 3, 3), cin * 9, cout * 9),
            gamma=1.0 + 0.02 * jax.random.normal(kg, (cout,), jnp.float32),
            beta=jnp.zeros((cout,), jnp.float32),
            rm=jnp.zeros((cout,), jnp.float32),     # running_mean
            rv=jnp.ones((cout,), jnp.float32))      # running_var

    raw = {"eps": eps}
    raw["stem"] = conv_bn(ks[0], ks[1], c_in, c1)
    raw["down"] = conv_bn(ks[2], ks[3], c1, c2)
    raw["res1"] = conv_bn(ks[4], ks[5], c2, c2)
    raw["res2"] = conv_bn(ks[6], ks[7], c2, c2)
    raw["w_fc"] = _xavier_uniform(ks[8], (c2, embed_dim), c2, embed_dim)
    raw["b_fc"] = jnp.zeros((embed_dim,), jnp.float32)
    raw["neck_gamma"] = 1.0 + 0.02 * jax.random.normal(ks[9], (embed_dim,),
                                                       jnp.float32)
    raw["neck_beta"] = jnp.zeros((embed_dim,), jnp.float32)
    raw["neck_rm"] = jnp.zeros((embed_dim,), jnp.float32)
    raw["neck_rv"] = jnp.ones((embed_dim,), jnp.float32)
    raw["w_cls"] = _xavier_uniform(ks[10], (embed_dim, num_classes),
                                   embed_dim, num_classes)

    def fold(layer, cin_pad=None):
        # proper eval-mode BN fold: scale = g/sqrt(rv+eps), shift = b - rm*scale
        w, gamma, beta, rm, rv = (layer["w"], layer["gamma"], layer["beta"],
                                  layer["rm"], layer["rv"])
        cout, cin = w.shape[0], w.shape[1]
        scale = gamma / jnp.sqrt(rv + eps)
        shift = beta - rm * scale
        taps = jnp.transpose(w, (2, 3, 0, 1)).reshape(9, cout, cin)
        taps = taps * scale[None, :, None]
        if cin_pad is not None and cin_pad > cin:
            taps = jnp.pad(taps, ((0, 0), (0, 0), (0, cin_pad - cin)))
        # tap-fused layout (Cout, 9*Cin): K axis = [tap0 ch0..C, tap1 ch0..C, ...]
        w_fused = jnp.transpose(taps, (1, 0, 2)).reshape(cout, -1)
        return w_fused, shift.reshape(cout, 1)

    p = {}
    p["w_stem"], p["s_stem"] = fold(raw["stem"], cin_pad=_round_up(c_in, 8))
    p["w_down"], p["s_down"] = fold(raw["down"])
    p["w_res1"], p["s_res1"] = fold(raw["res1"])
    p["w_res2"], p["s_res2"] = fold(raw["res2"])

    # FCs + BNNecks (BN1d eval + bias-free classifier) folded into one affine
    # map emitting the packed row [embed_1 | logits | zero pad].
    s_n = raw["neck_gamma"] / jnp.sqrt(raw["neck_rv"] + eps)
    w_log = (raw["w_fc"] * s_n[None, :]) @ raw["w_cls"]                 # (c2, cls)
    b_log = ((raw["b_fc"] - raw["neck_rm"]) * s_n + raw["neck_beta"]) @ raw["w_cls"]
    zw = jnp.zeros((c2, pack - embed_dim - num_classes), jnp.float32)
    zb = jnp.zeros((pack - embed_dim - num_classes,), jnp.float32)
    p["w_head"] = jnp.concatenate([raw["w_fc"], w_log, zw], axis=1)     # (c2, pack)
    p["b_head"] = jnp.concatenate([raw["b_fc"], b_log, zb]).reshape(1, pack)
    return p, raw


# ---------------------------------------------------------------------------
# Pure-JAX reference (same math, XLA convs) for numerical verification
# ---------------------------------------------------------------------------
def reference_forward(raw, imgs):
    eps = raw["eps"]

    def conv_bn_relu(x, layer, stride=1, residual=None):
        y = lax.conv_general_dilated(
            x, layer["w"], (stride, stride), ((1, 1), (1, 1)),
            dimension_numbers=("NCHW", "OIHW", "NCHW"),
            precision=lax.Precision.HIGHEST)
        scale = layer["gamma"] / jnp.sqrt(layer["rv"] + eps)
        shift = layer["beta"] - layer["rm"] * scale
        y = y * scale[None, :, None, None] + shift[None, :, None, None]
        if residual is not None:
            y = y + residual
        return jnp.maximum(y, 0.0)

    a = conv_bn_relu(imgs, raw["stem"])
    a = conv_bn_relu(a, raw["down"], stride=2)
    r = a
    a = conv_bn_relu(a, raw["res1"])
    a = conv_bn_relu(a, raw["res2"], residual=r)
    feat = jnp.mean(a, axis=(2, 3))                                   # (B, c2)
    embed_1 = feat @ raw["w_fc"] + raw["b_fc"]
    s_n = raw["neck_gamma"] / jnp.sqrt(raw["neck_rv"] + eps)
    embed_2 = (embed_1 - raw["neck_rm"]) * s_n + raw["neck_beta"]
    logits = embed_2 @ raw["w_cls"]
    return embed_1, logits


# ---------------------------------------------------------------------------
if __name__ == "__main__":
    key = jax.random.PRNGKey(0)
    k_params, k_img, k_lab = jax.random.split(key, 3)

    B, C_IN, H, W = 2, 3, 16, 16
    EMBED_DIM, NUM_CLASSES = 32, 16

    params, raw = build_params(k_params, c_in=C_IN, embed_dim=EMBED_DIM,
                               num_classes=NUM_CLASSES)
    imgs = jax.random.normal(k_img, (B, C_IN, H, W), jnp.float32)   # NCHW input
    labs = jax.random.randint(k_lab, (B,), 0, NUM_CLASSES)

    fwd = jax.jit(functools.partial(baseline_forward, params,
                                    embed_dim=EMBED_DIM,
                                    num_classes=NUM_CLASSES))
    out = fwd(imgs, labs)
    jax.block_until_ready(out)

    emb = out["inference_feat"]["embeddings"]
    lgt = out["inference_feat"]["logits"]
    assert emb.shape == (B, EMBED_DIM, 1), emb.shape
    assert lgt.shape == (B, NUM_CLASSES, 1), lgt.shape
    assert bool(jnp.all(jnp.isfinite(emb))) and bool(jnp.all(jnp.isfinite(lgt)))

    # numerical check against the pure-JAX reference
    ref_emb, ref_lgt = reference_forward(raw, imgs)
    np.testing.assert_allclose(np.asarray(emb[:, :, 0]), np.asarray(ref_emb),
                               rtol=3e-2, atol=3e-2)
    np.testing.assert_allclose(np.asarray(lgt[:, :, 0]), np.asarray(ref_lgt),
                               rtol=3e-2, atol=3e-2)

    print("KERNEL_OK")
</pallas_src>

<mosaic_0001>
module attributes {stable_mosaic.version = 11 : i64} {
  func.func @_baseline_fused_kernel(%arg0: i32, %arg1: memref<1x8x256xf32, #tpu.memory_space<vmem>>, %arg2: memref<9x256xf32, #tpu.memory_space<vmem>>, %arg3: memref<9x128xf32, #tpu.memory_space<vmem>>, %arg4: memref<256x128xf32, #tpu.memory_space<vmem>>, %arg5: memref<1x128xf32, #tpu.memory_space<vmem>>, %arg6: memref<16x72xf32, #tpu.memory_space<vmem>>, %arg7: memref<16x1xf32, #tpu.memory_space<vmem>>, %arg8: memref<32x144xf32, #tpu.memory_space<vmem>>, %arg9: memref<32x1xf32, #tpu.memory_space<vmem>>, %arg10: memref<32x288xf32, #tpu.memory_space<vmem>>, %arg11: memref<32x1xf32, #tpu.memory_space<vmem>>, %arg12: memref<32x288xf32, #tpu.memory_space<vmem>>, %arg13: memref<32x1xf32, #tpu.memory_space<vmem>>, %arg14: memref<32x128xf32, #tpu.memory_space<vmem>>, %arg15: memref<1x128xf32, #tpu.memory_space<vmem>>, %arg16: memref<1x1x128xf32, #tpu.memory_space<vmem>>) attributes {dimension_semantics = [#tpu.dimension_semantics<parallel>], iteration_bounds = array<i64: 2>, scalar_prefetch = 0 : i64, scratch_operands = 0 : i64, tpu.core_type = #tpu.core_type<tc>, window_params = [{transform_indices = @transform_0, window_bounds = array<i64: 1, 8, 256>}, {pipeline_mode = #tpu.pipeline_mode<synchronous>, transform_indices = @transform_1, window_bounds = array<i64: 9, 256>}, {pipeline_mode = #tpu.pipeline_mode<synchronous>, transform_indices = @transform_2, window_bounds = array<i64: 9, 128>}, {pipeline_mode = #tpu.pipeline_mode<synchronous>, transform_indices = @transform_3, window_bounds = array<i64: 256, 128>}, {pipeline_mode = #tpu.pipeline_mode<synchronous>, transform_indices = @transform_4, window_bounds = array<i64: 1, 128>}, {pipeline_mode = #tpu.pipeline_mode<synchronous>, transform_indices = @transform_5, window_bounds = array<i64: 16, 72>}, {pipeline_mode = #tpu.pipeline_mode<synchronous>, transform_indices = @transform_6, window_bounds = array<i64: 16, 1>}, {pipeline_mode = #tpu.pipeline_mode<synchronous>, transform_indices = @transform_7, window_bounds = array<i64: 32, 144>}, {pipeline_mode = #tpu.pipeline_mode<synchronous>, transform_indices = @transform_8, window_bounds = array<i64: 32, 1>}, {pipeline_mode = #tpu.pipeline_mode<synchronous>, transform_indices = @transform_9, window_bounds = array<i64: 32, 288>}, {pipeline_mode = #tpu.pipeline_mode<synchronous>, transform_indices = @transform_10, window_bounds = array<i64: 32, 1>}, {pipeline_mode = #tpu.pipeline_mode<synchronous>, transform_indices = @transform_11, window_bounds = array<i64: 32, 288>}, {pipeline_mode = #tpu.pipeline_mode<synchronous>, transform_indices = @transform_12, window_bounds = array<i64: 32, 1>}, {pipeline_mode = #tpu.pipeline_mode<synchronous>, transform_indices = @transform_13, window_bounds = array<i64: 32, 128>}, {pipeline_mode = #tpu.pipeline_mode<synchronous>, transform_indices = @transform_14, window_bounds = array<i64: 1, 128>}, {transform_indices = @transform_15, window_bounds = array<i64: 1, 1, 128>}]} {
    %c0 = arith.constant 0 : index
    %c0_0 = arith.constant 0 : index
    %0 = vector.load %arg2[%c0, %c0_0] : memref<9x256xf32, #tpu.memory_space<vmem>>, vector<9x256xf32>
    %c0_1 = arith.constant 0 : index
    %c0_2 = arith.constant 0 : index
    %1 = vector.load %arg3[%c0_1, %c0_2] : memref<9x128xf32, #tpu.memory_space<vmem>>, vector<9x128xf32>
    %c0_3 = arith.constant 0 : index
    %c0_4 = arith.constant 0 : index
    %c0_5 = arith.constant 0 : index
    %2 = vector.load %arg1[%c0_3, %c0_4, %c0_5] : memref<1x8x256xf32, #tpu.memory_space<vmem>>, vector<1x8x256xf32>
    %3 = vector.shape_cast %2 : vector<1x8x256xf32> to vector<8x256xf32>
    %c17_i32 = arith.constant 17 : i32
    %4 = tpu.dynamic_rotate %3 by %c17_i32 dim 1 : vector<8x256xf32>, i32 -> vector<8x256xf32>
    %5 = vector.extract_strided_slice %0 {offsets = [0, 0], sizes = [1, 256], strides = [1, 1]} : vector<9x256xf32> to vector<1x256xf32>
    %6 = vector.broadcast %5 : vector<1x256xf32> to vector<8x256xf32>
    %7 = arith.mulf %4, %6 : vector<8x256xf32>
    %c16_i32 = arith.constant 16 : i32
    %8 = tpu.dynamic_rotate %3 by %c16_i32 dim 1 : vector<8x256xf32>, i32 -> vector<8x256xf32>
    %9 = vector.extract_strided_slice %0 {offsets = [1, 0], sizes = [1, 256], strides = [1, 1]} : vector<9x256xf32> to vector<1x256xf32>
    %10 = vector.broadcast %9 : vector<1x256xf32> to vector<8x256xf32>
    %11 = arith.mulf %8, %10 : vector<8x256xf32>
    %c15_i32 = arith.constant 15 : i32
    %12 = tpu.dynamic_rotate %3 by %c15_i32 dim 1 : vector<8x256xf32>, i32 -> vector<8x256xf32>
    %13 = vector.extract_strided_slice %0 {offsets = [2, 0], sizes = [1, 256], strides = [1, 1]} : vector<9x256xf32> to vector<1x256xf32>
    %14 = vector.broadcast %13 : vector<1x256xf32> to vector<8x256xf32>
    %15 = arith.mulf %12, %14 : vector<8x256xf32>
    %c1_i32 = arith.constant 1 : i32
    %16 = tpu.dynamic_rotate %3 by %c1_i32 dim 1 : vector<8x256xf32>, i32 -> vector<8x256xf32>
    %17 = vector.extract_strided_slice %0 {offsets = [3, 0], sizes = [1, 256], strides = [1, 1]} : vector<9x256xf32> to vector<1x256xf32>
    %18 = vector.broadcast %17 : vector<1x256xf32> to vector<8x256xf32>
    %19 = arith.mulf %16, %18 : vector<8x256xf32>
    %20 = vector.extract_strided_slice %0 {offsets = [4, 0], sizes = [1, 256], strides = [1, 1]} : vector<9x256xf32> to vector<1x256xf32>
    %21 = vector.broadcast %20 : vector<1x256xf32> to vector<8x256xf32>
    %22 = arith.mulf %3, %21 : vector<8x256xf32>
    %c255_i32 = arith.constant 255 : i32
    %23 = tpu.dynamic_rotate %3 by %c255_i32 dim 1 : vector<8x256xf32>, i32 -> vector<8x256xf32>
    %24 = vector.extract_strided_slice %0 {offsets = [5, 0], sizes = [1, 256], strides = [1, 1]} : vector<9x256xf32> to vector<1x256xf32>
    %25 = vector.broadcast %24 : vector<1x256xf32> to vector<8x256xf32>
    %26 = arith.mulf %23, %25 : vector<8x256xf32>
    %c241_i32 = arith.constant 241 : i32
    %27 = tpu.dynamic_rotate %3 by %c241_i32 dim 1 : vector<8x256xf32>, i32 -> vector<8x256xf32>
    %28 = vector.extract_strided_slice %0 {offsets = [6, 0], sizes = [1, 256], strides = [1, 1]} : vector<9x256xf32> to vector<1x256xf32>
    %29 = vector.broadcast %28 : vector<1x256xf32> to vector<8x256xf32>
    %30 = arith.mulf %27, %29 : vector<8x256xf32>
    %c240_i32 = arith.constant 240 : i32
    %31 = tpu.dynamic_rotate %3 by %c240_i32 dim 1 : vector<8x256xf32>, i32 -> vector<8x256xf32>
    %32 = vector.extract_strided_slice %0 {offsets = [7, 0], sizes = [1, 256], strides = [1, 1]} : vector<9x256xf32> to vector<1x256xf32>
    %33 = vector.broadcast %32 : vector<1x256xf32> to vector<8x256xf32>
    %34 = arith.mulf %31, %33 : vector<8x256xf32>
    %c239_i32 = arith.constant 239 : i32
    %35 = tpu.dynamic_rotate %3 by %c239_i32 dim 1 : vector<8x256xf32>, i32 -> vector<8x256xf32>
    %36 = vector.extract_strided_slice %0 {offsets = [8, 0], sizes = [1, 256], strides = [1, 1]} : vector<9x256xf32> to vector<1x256xf32>
    %37 = vector.broadcast %36 : vector<1x256xf32> to vector<8x256xf32>
    %38 = arith.mulf %35, %37 : vector<8x256xf32>
    %39 = tpu.concatenate %7, %11, %15, %19, %22, %26, %30, %34, %38 in 0 : vector<8x256xf32>, vector<8x256xf32>, vector<8x256xf32>, vector<8x256xf32>, vector<8x256xf32>, vector<8x256xf32>, vector<8x256xf32>, vector<8x256xf32>, vector<8x256xf32> -> vector<72x256xf32>
    %c0_6 = arith.constant 0 : index
    %c0_7 = arith.constant 0 : index
    %40 = vector.load %arg6[%c0_6, %c0_7] : memref<16x72xf32, #tpu.memory_space<vmem>>, vector<16x72xf32>
    %cst = arith.constant dense<0.000000e+00> : vector<16x256xf32>
    %41 = tpu.matmul %40, %39, %cst {dimension_numbers = #tpu.dot_dimension_numbers<[1], [0], [0], [1], [0, 0, 1, 1], [], []>} : vector<16x72xf32>, vector<72x256xf32>, vector<16x256xf32> -> vector<16x256xf32>
    %c0_8 = arith.constant 0 : index
    %c0_9 = arith.constant 0 : index
    %42 = vector.load %arg7[%c0_8, %c0_9] : memref<16x1xf32, #tpu.memory_space<vmem>>, vector<16x1xf32>
    %43 = vector.broadcast %42 : vector<16x1xf32> to vector<16x256xf32>
    %44 = arith.addf %41, %43 : vector<16x256xf32>
    %cst_10 = arith.constant 0.000000e+00 : f32
    %45 = vector.broadcast %cst_10 : f32 to vector<16x256xf32>
    %46 = arith.maximumf %44, %45 : vector<16x256xf32>
    %c17_i32_11 = arith.constant 17 : i32
    %47 = tpu.dynamic_rotate %46 by %c17_i32_11 dim 1 : vector<16x256xf32>, i32 -> vector<16x256xf32>
    %48 = vector.extract_strided_slice %0 {offsets = [0, 0], sizes = [1, 256], strides = [1, 1]} : vector<9x256xf32> to vector<1x256xf32>
    %49 = vector.broadcast %48 : vector<1x256xf32> to vector<16x256xf32>
    %50 = arith.mulf %47, %49 : vector<16x256xf32>
    %c16_i32_12 = arith.constant 16 : i32
    %51 = tpu.dynamic_rotate %46 by %c16_i32_12 dim 1 : vector<16x256xf32>, i32 -> vector<16x256xf32>
    %52 = vector.extract_strided_slice %0 {offsets = [1, 0], sizes = [1, 256], strides = [1, 1]} : vector<9x256xf32> to vector<1x256xf32>
    %53 = vector.broadcast %52 : vector<1x256xf32> to vector<16x256xf32>
    %54 = arith.mulf %51, %53 : vector<16x256xf32>
    %c15_i32_13 = arith.constant 15 : i32
    %55 = tpu.dynamic_rotate %46 by %c15_i32_13 dim 1 : vector<16x256xf32>, i32 -> vector<16x256xf32>
    %56 = vector.extract_strided_slice %0 {offsets = [2, 0], sizes = [1, 256], strides = [1, 1]} : vector<9x256xf32> to vector<1x256xf32>
    %57 = vector.broadcast %56 : vector<1x256xf32> to vector<16x256xf32>
    %58 = arith.mulf %55, %57 : vector<16x256xf32>
    %c1_i32_14 = arith.constant 1 : i32
    %59 = tpu.dynamic_rotate %46 by %c1_i32_14 dim 1 : vector<16x256xf32>, i32 -> vector<16x256xf32>
    %60 = vector.extract_strided_slice %0 {offsets = [3, 0], sizes = [1, 256], strides = [1, 1]} : vector<9x256xf32> to vector<1x256xf32>
    %61 = vector.broadcast %60 : vector<1x256xf32> to vector<16x256xf32>
    %62 = arith.mulf %59, %61 : vector<16x256xf32>
    %63 = vector.extract_strided_slice %0 {offsets = [4, 0], sizes = [1, 256], strides = [1, 1]} : vector<9x256xf32> to vector<1x256xf32>
    %64 = vector.broadcast %63 : vector<1x256xf32> to vector<16x256xf32>
    %65 = arith.mulf %46, %64 : vector<16x256xf32>
    %c255_i32_15 = arith.constant 255 : i32
    %66 = tpu.dynamic_rotate %46 by %c255_i32_15 dim 1 : vector<16x256xf32>, i32 -> vector<16x256xf32>
    %67 = vector.extract_strided_slice %0 {offsets = [5, 0], sizes = [1, 256], strides = [1, 1]} : vector<9x256xf32> to vector<1x256xf32>
    %68 = vector.broadcast %67 : vector<1x256xf32> to vector<16x256xf32>
    %69 = arith.mulf %66, %68 : vector<16x256xf32>
    %c241_i32_16 = arith.constant 241 : i32
    %70 = tpu.dynamic_rotate %46 by %c241_i32_16 dim 1 : vector<16x256xf32>, i32 -> vector<16x256xf32>
    %71 = vector.extract_strided_slice %0 {offsets = [6, 0], sizes = [1, 256], strides = [1, 1]} : vector<9x256xf32> to vector<1x256xf32>
    %72 = vector.broadcast %71 : vector<1x256xf32> to vector<16x256xf32>
    %73 = arith.mulf %70, %72 : vector<16x256xf32>
    %c240_i32_17 = arith.constant 240 : i32
    %74 = tpu.dynamic_rotate %46 by %c240_i32_17 dim 1 : vector<16x256xf32>, i32 -> vector<16x256xf32>
    %75 = vector.extract_strided_slice %0 {offsets = [7, 0], sizes = [1, 256], strides = [1, 1]} : vector<9x256xf32> to vector<1x256xf32>
    %76 = vector.broadcast %75 : vector<1x256xf32> to vector<16x256xf32>
    %77 = arith.mulf %74, %76 : vector<16x256xf32>
    %c239_i32_18 = arith.constant 239 : i32
    %78 = tpu.dynamic_rotate %46 by %c239_i32_18 dim 1 : vector<16x256xf32>, i32 -> vector<16x256xf32>
    %79 = vector.extract_strided_slice %0 {offsets = [8, 0], sizes = [1, 256], strides = [1, 1]} : vector<9x256xf32> to vector<1x256xf32>
    %80 = vector.broadcast %79 : vector<1x256xf32> to vector<16x256xf32>
    %81 = arith.mulf %78, %80 : vector<16x256xf32>
    %82 = tpu.concatenate %50, %54, %58, %62, %65, %69, %73, %77, %81 in 0 : vector<16x256xf32>, vector<16x256xf32>, vector<16x256xf32>, vector<16x256xf32>, vector<16x256xf32>, vector<16x256xf32>, vector<16x256xf32>, vector<16x256xf32>, vector<16x256xf32> -> vector<144x256xf32>
    %c0_19 = arith.constant 0 : index
    %c0_20 = arith.constant 0 : index
    %83 = vector.load %arg8[%c0_19, %c0_20] : memref<32x144xf32, #tpu.memory_space<vmem>>, vector<32x144xf32>
    %cst_21 = arith.constant dense<0.000000e+00> : vector<32x256xf32>
    %84 = tpu.matmul %83, %82, %cst_21 {dimension_numbers = #tpu.dot_dimension_numbers<[1], [0], [0], [1], [0, 0, 1, 1], [], []>} : vector<32x144xf32>, vector<144x256xf32>, vector<32x256xf32> -> vector<32x256xf32>
    %c0_22 = arith.constant 0 : index
    %c0_23 = arith.constant 0 : index
    %85 = vector.load %arg9[%c0_22, %c0_23] : memref<32x1xf32, #tpu.memory_space<vmem>>, vector<32x1xf32>
    %86 = vector.broadcast %85 : vector<32x1xf32> to vector<32x256xf32>
    %87 = arith.addf %84, %86 : vector<32x256xf32>
    %cst_24 = arith.constant 0.000000e+00 : f32
    %88 = vector.broadcast %cst_24 : f32 to vector<32x256xf32>
    %89 = arith.maximumf %87, %88 : vector<32x256xf32>
    %c0_25 = arith.constant 0 : index
    %c0_26 = arith.constant 0 : index
    %90 = vector.load %arg4[%c0_25, %c0_26] : memref<256x128xf32, #tpu.memory_space<vmem>>, vector<256x128xf32>
    %cst_27 = arith.constant dense<0.000000e+00> : vector<32x128xf32>
    %91 = tpu.matmul %89, %90, %cst_27 {dimension_numbers = #tpu.dot_dimension_numbers<[1], [0], [0], [1], [0, 0, 1, 1], [], []>} : vector<32x256xf32>, vector<256x128xf32>, vector<32x128xf32> -> vector<32x128xf32>
    %c9_i32 = arith.constant 9 : i32
    %92 = tpu.dynamic_rotate %91 by %c9_i32 dim 1 : vector<32x128xf32>, i32 -> vector<32x128xf32>
    %93 = vector.extract_strided_slice %1 {offsets = [0, 0], sizes = [1, 128], strides = [1, 1]} : vector<9x128xf32> to vector<1x128xf32>
    %94 = vector.broadcast %93 : vector<1x128xf32> to vector<32x128xf32>
    %95 = arith.mulf %92, %94 : vector<32x128xf32>
    %c8_i32 = arith.constant 8 : i32
    %96 = tpu.dynamic_rotate %91 by %c8_i32 dim 1 : vector<32x128xf32>, i32 -> vector<32x128xf32>
    %97 = vector.extract_strided_slice %1 {offsets = [1, 0], sizes = [1, 128], strides = [1, 1]} : vector<9x128xf32> to vector<1x128xf32>
    %98 = vector.broadcast %97 : vector<1x128xf32> to vector<32x128xf32>
    %99 = arith.mulf %96, %98 : vector<32x128xf32>
    %c7_i32 = arith.constant 7 : i32
    %100 = tpu.dynamic_rotate %91 by %c7_i32 dim 1 : vector<32x128xf32>, i32 -> vector<32x128xf32>
    %101 = vector.extract_strided_slice %1 {offsets = [2, 0], sizes = [1, 128], strides = [1, 1]} : vector<9x128xf32> to vector<1x128xf32>
    %102 = vector.broadcast %101 : vector<1x128xf32> to vector<32x128xf32>
    %103 = arith.mulf %100, %102 : vector<32x128xf32>
    %c1_i32_28 = arith.constant 1 : i32
    %104 = tpu.dynamic_rotate %91 by %c1_i32_28 dim 1 : vector<32x128xf32>, i32 -> vector<32x128xf32>
    %105 = vector.extract_strided_slice %1 {offsets = [3, 0], sizes = [1, 128], strides = [1, 1]} : vector<9x128xf32> to vector<1x128xf32>
    %106 = vector.broadcast %105 : vector<1x128xf32> to vector<32x128xf32>
    %107 = arith.mulf %104, %106 : vector<32x128xf32>
    %108 = vector.extract_strided_slice %1 {offsets = [4, 0], sizes = [1, 128], strides = [1, 1]} : vector<9x128xf32> to vector<1x128xf32>
    %109 = vector.broadcast %108 : vector<1x128xf32> to vector<32x128xf32>
    %110 = arith.mulf %91, %109 : vector<32x128xf32>
    %c127_i32 = arith.constant 127 : i32
    %111 = tpu.dynamic_rotate %91 by %c127_i32 dim 1 : vector<32x128xf32>, i32 -> vector<32x128xf32>
    %112 = vector.extract_strided_slice %1 {offsets = [5, 0], sizes = [1, 128], strides = [1, 1]} : vector<9x128xf32> to vector<1x128xf32>
    %113 = vector.broadcast %112 : vector<1x128xf32> to vector<32x128xf32>
    %114 = arith.mulf %111, %113 : vector<32x128xf32>
    %c121_i32 = arith.constant 121 : i32
    %115 = tpu.dynamic_rotate %91 by %c121_i32 dim 1 : vector<32x128xf32>, i32 -> vector<32x128xf32>
    %116 = vector.extract_strided_slice %1 {offsets = [6, 0], sizes = [1, 128], strides = [1, 1]} : vector<9x128xf32> to vector<1x128xf32>
    %117 = vector.broadcast %116 : vector<1x128xf32> to vector<32x128xf32>
    %118 = arith.mulf %115, %117 : vector<32x128xf32>
    %c120_i32 = arith.constant 120 : i32
    %119 = tpu.dynamic_rotate %91 by %c120_i32 dim 1 : vector<32x128xf32>, i32 -> vector<32x128xf32>
    %120 = vector.extract_strided_slice %1 {offsets = [7, 0], sizes = [1, 128], strides = [1, 1]} : vector<9x128xf32> to vector<1x128xf32>
    %121 = vector.broadcast %120 : vector<1x128xf32> to vector<32x128xf32>
    %122 = arith.mulf %119, %121 : vector<32x128xf32>
    %c119_i32 = arith.constant 119 : i32
    %123 = tpu.dynamic_rotate %91 by %c119_i32 dim 1 : vector<32x128xf32>, i32 -> vector<32x128xf32>
    %124 = vector.extract_strided_slice %1 {offsets = [8, 0], sizes = [1, 128], strides = [1, 1]} : vector<9x128xf32> to vector<1x128xf32>
    %125 = vector.broadcast %124 : vector<1x128xf32> to vector<32x128xf32>
    %126 = arith.mulf %123, %125 : vector<32x128xf32>
    %127 = tpu.concatenate %95, %99, %103, %107, %110, %114, %118, %122, %126 in 0 : vector<32x128xf32>, vector<32x128xf32>, vector<32x128xf32>, vector<32x128xf32>, vector<32x128xf32>, vector<32x128xf32>, vector<32x128xf32>, vector<32x128xf32>, vector<32x128xf32> -> vector<288x128xf32>
    %c0_29 = arith.constant 0 : index
    %c0_30 = arith.constant 0 : index
    %128 = vector.load %arg10[%c0_29, %c0_30] : memref<32x288xf32, #tpu.memory_space<vmem>>, vector<32x288xf32>
    %cst_31 = arith.constant dense<0.000000e+00> : vector<32x128xf32>
    %129 = tpu.matmul %128, %127, %cst_31 {dimension_numbers = #tpu.dot_dimension_numbers<[1], [0], [0], [1], [0, 0, 1, 1], [], []>} : vector<32x288xf32>, vector<288x128xf32>, vector<32x128xf32> -> vector<32x128xf32>
    %c0_32 = arith.constant 0 : index
    %c0_33 = arith.constant 0 : index
    %130 = vector.load %arg11[%c0_32, %c0_33] : memref<32x1xf32, #tpu.memory_space<vmem>>, vector<32x1xf32>
    %131 = vector.broadcast %130 : vector<32x1xf32> to vector<32x128xf32>
    %132 = arith.addf %129, %131 : vector<32x128xf32>
    %cst_34 = arith.constant 0.000000e+00 : f32
    %133 = vector.broadcast %cst_34 : f32 to vector<32x128xf32>
    %134 = arith.maximumf %132, %133 : vector<32x128xf32>
    %c9_i32_35 = arith.constant 9 : i32
    %135 = tpu.dynamic_rotate %134 by %c9_i32_35 dim 1 : vector<32x128xf32>, i32 -> vector<32x128xf32>
    %136 = vector.extract_strided_slice %1 {offsets = [0, 0], sizes = [1, 128], strides = [1, 1]} : vector<9x128xf32> to vector<1x128xf32>
    %137 = vector.broadcast %136 : vector<1x128xf32> to vector<32x128xf32>
    %138 = arith.mulf %135, %137 : vector<32x128xf32>
    %c8_i32_36 = arith.constant 8 : i32
    %139 = tpu.dynamic_rotate %134 by %c8_i32_36 dim 1 : vector<32x128xf32>, i32 -> vector<32x128xf32>
    %140 = vector.extract_strided_slice %1 {offsets = [1, 0], sizes = [1, 128], strides = [1, 1]} : vector<9x128xf32> to vector<1x128xf32>
    %141 = vector.broadcast %140 : vector<1x128xf32> to vector<32x128xf32>
    %142 = arith.mulf %139, %141 : vector<32x128xf32>
    %c7_i32_37 = arith.constant 7 : i32
    %143 = tpu.dynamic_rotate %134 by %c7_i32_37 dim 1 : vector<32x128xf32>, i32 -> vector<32x128xf32>
    %144 = vector.extract_strided_slice %1 {offsets = [2, 0], sizes = [1, 128], strides = [1, 1]} : vector<9x128xf32> to vector<1x128xf32>
    %145 = vector.broadcast %144 : vector<1x128xf32> to vector<32x128xf32>
    %146 = arith.mulf %143, %145 : vector<32x128xf32>
    %c1_i32_38 = arith.constant 1 : i32
    %147 = tpu.dynamic_rotate %134 by %c1_i32_38 dim 1 : vector<32x128xf32>, i32 -> vector<32x128xf32>
    %148 = vector.extract_strided_slice %1 {offsets = [3, 0], sizes = [1, 128], strides = [1, 1]} : vector<9x128xf32> to vector<1x128xf32>
    %149 = vector.broadcast %148 : vector<1x128xf32> to vector<32x128xf32>
    %150 = arith.mulf %147, %149 : vector<32x128xf32>
    %151 = vector.extract_strided_slice %1 {offsets = [4, 0], sizes = [1, 128], strides = [1, 1]} : vector<9x128xf32> to vector<1x128xf32>
    %152 = vector.broadcast %151 : vector<1x128xf32> to vector<32x128xf32>
    %153 = arith.mulf %134, %152 : vector<32x128xf32>
    %c127_i32_39 = arith.constant 127 : i32
    %154 = tpu.dynamic_rotate %134 by %c127_i32_39 dim 1 : vector<32x128xf32>, i32 -> vector<32x128xf32>
    %155 = vector.extract_strided_slice %1 {offsets = [5, 0], sizes = [1, 128], strides = [1, 1]} : vector<9x128xf32> to vector<1x128xf32>
    %156 = vector.broadcast %155 : vector<1x128xf32> to vector<32x128xf32>
    %157 = arith.mulf %154, %156 : vector<32x128xf32>
    %c121_i32_40 = arith.constant 121 : i32
    %158 = tpu.dynamic_rotate %134 by %c121_i32_40 dim 1 : vector<32x128xf32>, i32 -> vector<32x128xf32>
    %159 = vector.extract_strided_slice %1 {offsets = [6, 0], sizes = [1, 128], strides = [1, 1]} : vector<9x128xf32> to vector<1x128xf32>
    %160 = vector.broadcast %159 : vector<1x128xf32> to vector<32x128xf32>
    %161 = arith.mulf %158, %160 : vector<32x128xf32>
    %c120_i32_41 = arith.constant 120 : i32
    %162 = tpu.dynamic_rotate %134 by %c120_i32_41 dim 1 : vector<32x128xf32>, i32 -> vector<32x128xf32>
    %163 = vector.extract_strided_slice %1 {offsets = [7, 0], sizes = [1, 128], strides = [1, 1]} : vector<9x128xf32> to vector<1x128xf32>
    %164 = vector.broadcast %163 : vector<1x128xf32> to vector<32x128xf32>
    %165 = arith.mulf %162, %164 : vector<32x128xf32>
    %c119_i32_42 = arith.constant 119 : i32
    %166 = tpu.dynamic_rotate %134 by %c119_i32_42 dim 1 : vector<32x128xf32>, i32 -> vector<32x128xf32>
    %167 = vector.extract_strided_slice %1 {offsets = [8, 0], sizes = [1, 128], strides = [1, 1]} : vector<9x128xf32> to vector<1x128xf32>
    %168 = vector.broadcast %167 : vector<1x128xf32> to vector<32x128xf32>
    %169 = arith.mulf %166, %168 : vector<32x128xf32>
    %170 = tpu.concatenate %138, %142, %146, %150, %153, %157, %161, %165, %169 in 0 : vector<32x128xf32>, vector<32x128xf32>, vector<32x128xf32>, vector<32x128xf32>, vector<32x128xf32>, vector<32x128xf32>, vector<32x128xf32>, vector<32x128xf32>, vector<32x128xf32> -> vector<288x128xf32>
    %c0_43 = arith.constant 0 : index
    %c0_44 = arith.constant 0 : index
    %171 = vector.load %arg12[%c0_43, %c0_44] : memref<32x288xf32, #tpu.memory_space<vmem>>, vector<32x288xf32>
    %cst_45 = arith.constant dense<0.000000e+00> : vector<32x128xf32>
    %172 = tpu.matmul %171, %170, %cst_45 {dimension_numbers = #tpu.dot_dimension_numbers<[1], [0], [0], [1], [0, 0, 1, 1], [], []>} : vector<32x288xf32>, vector<288x128xf32>, vector<32x128xf32> -> vector<32x128xf32>
    %c0_46 = arith.constant 0 : index
    %c0_47 = arith.constant 0 : index
    %173 = vector.load %arg13[%c0_46, %c0_47] : memref<32x1xf32, #tpu.memory_space<vmem>>, vector<32x1xf32>
    %174 = vector.broadcast %173 : vector<32x1xf32> to vector<32x128xf32>
    %175 = arith.addf %172, %174 : vector<32x128xf32>
    %176 = arith.addf %175, %91 : vector<32x128xf32>
    %cst_48 = arith.constant 0.000000e+00 : f32
    %177 = vector.broadcast %cst_48 : f32 to vector<32x128xf32>
    %178 = arith.maximumf %176, %177 : vector<32x128xf32>
    %c0_49 = arith.constant 0 : index
    %c0_50 = arith.constant 0 : index
    %179 = vector.load %arg5[%c0_49, %c0_50] : memref<1x128xf32, #tpu.memory_space<vmem>>, vector<1x128xf32>
    %cst_51 = arith.constant dense<0.000000e+00> : vector<1x32xf32>
    %180 = tpu.matmul %179, %178, %cst_51 {dimension_numbers = #tpu.dot_dimension_numbers<[1], [1], [0], [0], [0, 0, 1, 0], [], []>} : vector<1x128xf32>, vector<32x128xf32>, vector<1x32xf32> -> vector<1x32xf32>
    %c0_52 = arith.constant 0 : index
    %c0_53 = arith.constant 0 : index
    %181 = vector.load %arg14[%c0_52, %c0_53] : memref<32x128xf32, #tpu.memory_space<vmem>>, vector<32x128xf32>
    %cst_54 = arith.constant dense<0.000000e+00> : vector<1x128xf32>
    %182 = tpu.matmul %180, %181, %cst_54 {dimension_numbers = #tpu.dot_dimension_numbers<[1], [0], [0], [1], [0, 0, 1, 1], [], []>} : vector<1x32xf32>, vector<32x128xf32>, vector<1x128xf32> -> vector<1x128xf32>
    %c0_55 = arith.constant 0 : index
    %c0_56 = arith.constant 0 : index
    %183 = vector.load %arg15[%c0_55, %c0_56] : memref<1x128xf32, #tpu.memory_space<vmem>>, vector<1x128xf32>
    %184 = arith.addf %182, %183 : vector<1x128xf32>
    %c0_57 = arith.constant 0 : index
    %c0_58 = arith.constant 0 : index
    %c0_59 = arith.constant 0 : index
    %185 = vector.load %arg16[%c0_57, %c0_58, %c0_59] : memref<1x1x128xf32, #tpu.memory_space<vmem>>, vector<1x1x128xf32>
    %186 = vector.shape_cast %185 : vector<1x1x128xf32> to vector<1x128xf32>
    %187 = vector.shape_cast %184 : vector<1x128xf32> to vector<1x1x128xf32>
    tpu.vector_store %arg16[%c0_57, %c0_58, %c0_59], %187 {strides = array<i32>} : memref<1x1x128xf32, #tpu.memory_space<vmem>>, vector<1x1x128xf32>,
    return
  }
  func.func @transform_0(%arg0: i32) -> (i32, i32, i32) {
    %c0_i32 = arith.constant 0 : i32
    %c0_i32_0 = arith.constant 0 : i32
    %c0_i32_1 = arith.constant 0 : i32
    return %arg0, %c0_i32, %c0_i32_0 : i32, i32, i32
  }
  func.func @transform_1(%arg0: i32) -> (i32, i32) {
    %c0_i32 = arith.constant 0 : i32
    %c0_i32_0 = arith.constant 0 : i32
    %c0_i32_1 = arith.constant 0 : i32
    return %c0_i32, %c0_i32_0 : i32, i32
  }
  func.func @transform_2(%arg0: i32) -> (i32, i32) {
    %c0_i32 = arith.constant 0 : i32
    %c0_i32_0 = arith.constant 0 : i32
    %c0_i32_1 = arith.constant 0 : i32
    return %c0_i32, %c0_i32_0 : i32, i32
  }
  func.func @transform_3(%arg0: i32) -> (i32, i32) {
    %c0_i32 = arith.constant 0 : i32
    %c0_i32_0 = arith.constant 0 : i32
    %c0_i32_1 = arith.constant 0 : i32
    return %c0_i32, %c0_i32_0 : i32, i32
  }
  func.func @transform_4(%arg0: i32) -> (i32, i32) {
    %c0_i32 = arith.constant 0 : i32
    %c0_i32_0 = arith.constant 0 : i32
    %c0_i32_1 = arith.constant 0 : i32
    return %c0_i32, %c0_i32_0 : i32, i32
  }
  func.func @transform_5(%arg0: i32) -> (i32, i32) {
    %c0_i32 = arith.constant 0 : i32
    %c0_i32_0 = arith.constant 0 : i32
    %c0_i32_1 = arith.constant 0 : i32
    return %c0_i32, %c0_i32_0 : i32, i32
  }
  func.func @transform_6(%arg0: i32) -> (i32, i32) {
    %c0_i32 = arith.constant 0 : i32
    %c0_i32_0 = arith.constant 0 : i32
    %c0_i32_1 = arith.constant 0 : i32
    return %c0_i32, %c0_i32_0 : i32, i32
  }
  func.func @transform_7(%arg0: i32) -> (i32, i32) {
    %c0_i32 = arith.constant 0 : i32
    %c0_i32_0 = arith.constant 0 : i32
    %c0_i32_1 = arith.constant 0 : i32
    return %c0_i32, %c0_i32_0 : i32, i32
  }
  func.func @transform_8(%arg0: i32) -> (i32, i32) {
    %c0_i32 = arith.constant 0 : i32
    %c0_i32_0 = arith.constant 0 : i32
    %c0_i32_1 = arith.constant 0 : i32
    return %c0_i32, %c0_i32_0 : i32, i32
  }
  func.func @transform_9(%arg0: i32) -> (i32, i32) {
    %c0_i32 = arith.constant 0 : i32
    %c0_i32_0 = arith.constant 0 : i32
    %c0_i32_1 = arith.constant 0 : i32
    return %c0_i32, %c0_i32_0 : i32, i32
  }
  func.func @transform_10(%arg0: i32) -> (i32, i32) {
    %c0_i32 = arith.constant 0 : i32
    %c0_i32_0 = arith.constant 0 : i32
    %c0_i32_1 = arith.constant 0 : i32
    return %c0_i32, %c0_i32_0 : i32, i32
  }
  func.func @transform_11(%arg0: i32) -> (i32, i32) {
    %c0_i32 = arith.constant 0 : i32
    %c0_i32_0 = arith.constant 0 : i32
    %c0_i32_1 = arith.constant 0 : i32
    return %c0_i32, %c0_i32_0 : i32, i32
  }
  func.func @transform_12(%arg0: i32) -> (i32, i32) {
    %c0_i32 = arith.constant 0 : i32
    %c0_i32_0 = arith.constant 0 : i32
    %c0_i32_1 = arith.constant 0 : i32
    return %c0_i32, %c0_i32_0 : i32, i32
  }
  func.func @transform_13(%arg0: i32) -> (i32, i32) {
    %c0_i32 = arith.constant 0 : i32
    %c0_i32_0 = arith.constant 0 : i32
    %c0_i32_1 = arith.constant 0 : i32
    return %c0_i32, %c0_i32_0 : i32, i32
  }
  func.func @transform_14(%arg0: i32) -> (i32, i32) {
    %c0_i32 = arith.constant 0 : i32
    %c0_i32_0 = arith.constant 0 : i32
    %c0_i32_1 = arith.constant 0 : i32
    return %c0_i32, %c0_i32_0 : i32, i32
  }
  func.func @transform_15(%arg0: i32) -> (i32, i32, i32) {
    %c0_i32 = arith.constant 0 : i32
    %c0_i32_0 = arith.constant 0 : i32
    %c0_i32_1 = arith.constant 0 : i32
    return %arg0, %c0_i32, %c0_i32_0 : i32, i32, i32
  }
}

</mosaic_0001>

<bundles_post_ra>
// kernel: baseline_forward.1
= control target key start
LH: loop header
LB: loop body
LE: loop exit
PB: predicated region body
PF: predicated region fallthrough
CT: control target
= control target key end

     0   :  { %s3839_s0 = inlined_call_operand.vmem [shape: f32[2,8,256], index: 0, kind: input, shape index: {}]   ;;  %s3840_s1 = inlined_call_operand.hbm [shape: f32[9,256], index: 1, kind: input, shape index: {}]   ;;  %s3841_s2 = inlined_call_operand.hbm [shape: f32[9,128], index: 2, kind: input, shape index: {}]   ;;  %s3842_s3 = inlined_call_operand.hbm [shape: f32[256,128], index: 3, kind: input, shape index: {}]   ;;  %s3843_s4 = inlined_call_operand.vmem [shape: f32[1,128], index: 4, kind: input, shape index: {}]   ;;  %s3844_s5 = inlined_call_operand.hbm [shape: f32[16,72], index: 5, kind: input, shape index: {}]   ;;  %s3845_s6 = inlined_call_operand.vmem [shape: f32[16,1], index: 6, kind: input, shape index: {}]   ;;  %s3846_s7 = inlined_call_operand.hbm [shape: f32[32,144], index: 7, kind: input, shape index: {}]   ;;  %s3847_s8 = inlined_call_operand.vmem [shape: f32[32,1], index: 8, kind: input, shape index: {}, may-alias: {8,10,12}]   ;;  %s3848_s9 = inlined_call_operand.vmem [shape: f32[32,288], index: 9, kind: input, shape index: {}]   ;;  %s3849_s10 = inlined_call_operand.vmem [shape: f32[32,1], index: 10, kind: input, shape index: {}, may-alias: {8,10,12}]   ;;  %s3850_s11 = inlined_call_operand.vmem [shape: f32[32,288], index: 11, kind: input, shape index: {}]   ;;  %s3851_s12 = inlined_call_operand.vmem [shape: f32[32,1], index: 12, kind: input, shape index: {}, may-alias: {8,10,12}]   ;;  %s3852_s13 = inlined_call_operand.vmem [shape: f32[32,128], index: 13, kind: input, shape index: {}]   ;;  %s3853_s14 = inlined_call_operand.vmem [shape: f32[1,128], index: 14, kind: input, shape index: {}]   ;;  %s3854_s15 = inlined_call_operand.vmem [shape: f32[2,1,128], index: 15, kind: output, shape index: {}]  }
   0x1   :  { %3861 = sst [smem:[#allocation14_spill]] %s3843_s4 }
   0x2   :  { %3862 = sst [smem:[#allocation15_spill]] %s3853_s14 }
   0x3   :  { %3863 = sst [smem:[#allocation16_spill]] %s3854_s15 }
   0x4   :  { %20 = vsyncpa [#allocation3], 0 }
   0x5   :  { %21 = vsyncpa [#allocation5], 0 }
   0x6   :  { %22 = vsyncpa [#allocation8], 0  ;;  %s2917_s18 = smov 0  }
   0x7 LB: > { %3864 = sst [smem:[#allocation13_spill]] %s2808_s18  ;;  %s2810_s19 = smov [#allocation4]   ;;  %s2808_s18 = sphi %s2917_s18, %s28_s18  }
   0x8   : > { %s404_s20 = sshll.u32 %s2810_s19, 4  ;;  %s2923_s21 = sadd.s32 4294967295, %s2808_s18   ;;  %s2928_s20 = int_to_ptr.vmem [resolvable:$true] %s404_s20 }
   0x9   : > { %p2147_p0 = scmp.ge.s32.totalorder %s2808_s18, 1  ;;  %p379_p1 = scmp.lt.s32.totalorder %s2808_s18, 3 }
   0xa   : > { %p3858_p2 = scmp.eq.s32.totalorder %s2923_s21, 0  ;;  %s2811_s23 = smov [#allocation7]  }
   0xb   : > { %p2930_p3 = pnand %p2147_p0, %p379_p1  ;;  %s433_s24 = sshll.u32 %s2811_s23, 4  ;;  %s2936_s24 = int_to_ptr.vmem [resolvable:$true] %s433_s24 }
   0xc   : > { %s2812_s26 = smov [#allocation2]   ;;  %s2650_s30 = scalar_lea.hbm %s3841_s2, 256 }
   0xd   : > { %s3865_s22 = scalar_select %p2930_p3, 1, 0 }
   0xe   : > { %p2587_p4 = pneg %p2930_p3  ;;  %s391_s27 = sshll.u32 %s2812_s26, 4  ;;  %s2944_s27 = int_to_ptr.vmem [resolvable:$true] %s391_s27 }
   0xf   : > { %p2651_p6 = scmp.ne.s32.totalorder %s3841_s2, %s2650_s30  ;;  %p2657_p10 = scmp.lt.u32.totalorder %s2650_s30, %s3841_s2 }
  0x10   : > { %p2940_p5 = pnand %p3858_p2, %p2587_p4 }
  0x12   : > { %p2954_p7 = pneg %p2940_p5 }
  0x14   : > { %p2653_p8 = pnand %p2954_p7, %p2651_p6 }
  0x16   : > { %p2654_p9 = pneg %p2653_p8 }
  0x18   : > { %p2659_p11 = pnand %p2657_p10, %p2654_p9 }
  0x1a   : > { %2662 = shalt.err (!%p2659_p11)
}
  0x1b   : > { %s2663_s28 = scalar_lea.vmem %s2928_s20, 256  ;;  %p2671_p1 = scmp.lt.s32.totalorder %s2928_s20, %s2928_s20 }
  0x1c   : > { %p2664_p12 = scmp.ne.s32.totalorder %s2928_s20, %s2663_s28  ;;  %p2672_p4 = scmp.lt.s32.totalorder %s2663_s28, %s2663_s28 }
  0x1e   : > { %p2666_p13 = pnand %p2664_p12, %p2954_p7  ;;  %p2673_p6 = por %p2672_p4, %p2671_p1 }
  0x20   : > { %p2667_p0 = pneg %p2666_p13 }
  0x22   : > { %p2674_p8 = pnand %p2673_p6, %p2667_p0 }
  0x24   : > { %2677 = shalt.err (!%p2674_p8)
}
  0x25   : > { %s3856_s29 = smov 128   ;;  %s3857_s30 = smov 8  }
  0x26   : > { %2593 = dma.hbm_to_vmem [thread:$0]  (!%p2940_p5), %s3841_s2, 256, %s2928_s20, [#allocation5], %s3856_s29, %s3856_s29, %s3857_s30  }
  0x27   : > { %s2678_s28 = scalar_lea.hbm %s3844_s5, 256 }
  0x28   : > { %p2679_p9 = scmp.ne.s32.totalorder %s3844_s5, %s2678_s28  ;;  %p2685_p12 = scmp.lt.u32.totalorder %s2678_s28, %s3844_s5 }
  0x2a   : > { %p2681_p10 = pnand %p2679_p9, %p2954_p7 }
  0x2c   : > { %p2682_p11 = pneg %p2681_p10 }
  0x2e   : > { %p2687_p13 = pnand %p2685_p12, %p2682_p11 }
  0x30   : > { %2690 = shalt.err (!%p2687_p13)
}
  0x31   : > { %s2691_s20 = scalar_lea.vmem %s2936_s24, 256  ;;  %p2699_p6 = scmp.lt.s32.totalorder %s2936_s24, %s2936_s24 }
  0x32   : > { %p2692_p0 = scmp.ne.s32.totalorder %s2936_s24, %s2691_s20  ;;  %p2700_p8 = scmp.lt.s32.totalorder %s2691_s20, %s2691_s20 }
  0x34   : > { %p2694_p1 = pnand %p2692_p0, %p2954_p7  ;;  %p2701_p9 = por %p2700_p8, %p2699_p6 }
  0x36   : > { %p2695_p4 = pneg %p2694_p1 }
  0x38   : > { %p2702_p10 = pnand %p2701_p9, %p2695_p4 }
  0x3a   : > { %2705 = shalt.err (!%p2702_p10)
}
  0x3b   : > { %2599 = dma.hbm_to_vmem [thread:$0]  (!%p2940_p5), %s3844_s5, 256, %s2936_s24, [#allocation8], %s3856_s29, %s3856_s29, %s3857_s30  }
  0x3c   : > { %s2706_s16 = scalar_lea.hbm %s3840_s1, 512 }
  0x3d   : > { %p2707_p11 = scmp.ne.s32.totalorder %s3840_s1, %s2706_s16  ;;  %p2713_p0 = scmp.lt.u32.totalorder %s2706_s16, %s3840_s1 }
  0x3f   : > { %p2709_p12 = pnand %p2707_p11, %p2954_p7 }
  0x41   : > { %p2710_p13 = pneg %p2709_p12 }
  0x43   : > { %p2715_p1 = pnand %p2713_p0, %p2710_p13 }
  0x45   : > { %2718 = shalt.err (!%p2715_p1)
}
  0x46   : > { %s2719_s24 = scalar_lea.vmem %s2944_s27, 512  ;;  %p2727_p9 = scmp.lt.s32.totalorder %s2944_s27, %s2944_s27 }
  0x47   : > { %p2720_p4 = scmp.ne.s32.totalorder %s2944_s27, %s2719_s24  ;;  %p2728_p10 = scmp.lt.s32.totalorder %s2719_s24, %s2719_s24 }
  0x49   : > { %p2722_p6 = pnand %p2720_p4, %p2954_p7  ;;  %p2729_p11 = por %p2728_p10, %p2727_p9 }
  0x4b   : > { %p2723_p8 = pneg %p2722_p6 }
  0x4d   : > { %p2730_p12 = pnand %p2729_p11, %p2723_p8 }
  0x4f   : > { %2733 = shalt.err (!%p2730_p12)
}
  0x50   : > { %s3860_s20 = smov 256   ;;  %s2816_s4 = smov 16  }
  0x51   : > { %2590 = dma.hbm_to_vmem [thread:$0]  (!%p2940_p5), %s3840_s1, 512, %s2944_s27, [#allocation3], %s3860_s20, %s3860_s20, %s2816_s4  }
  0x52   : > { %s2817_s18 = smov [#allocation6]   ;;  %s2818_s17 = smov [#allocation9]  }
  0x53   : > { %s417_s16 = sshll.u32 %s2817_s18, 4  ;;  %s449_s23 = sshll.u32 %s2818_s17, 4  ;;  %s418_s16 = int_to_ptr.vmem [resolvable:$true] %s417_s16  ;;  %s3030_s23 = int_to_ptr.vmem [resolvable:$true] %s449_s23 }
  0x54   : > { %s2734_s24 = scalar_lea.hbm %s3842_s3, 4096 }
  0x55   : > { %p2735_p13 = scmp.ne.s32.totalorder %s3842_s3, %s2734_s24  ;;  %p2741_p4 = scmp.lt.u32.totalorder %s2734_s24, %s3842_s3 }
  0x57   : > { %p2737_p0 = pnand %p2735_p13, %p2954_p7 }
  0x59   : > { %p2738_p1 = pneg %p2737_p0 }
  0x5b   : > { %p2743_p6 = pnand %p2741_p4, %p2738_p1 }
  0x5d   : > { %2746 = shalt.err (!%p2743_p6)
}
  0x5e   : > { %s2747_s15 = scalar_lea.vmem %s418_s16, 4096  ;;  %p2755_p11 = scmp.lt.s32.totalorder %s418_s16, %s418_s16 }
  0x5f   : > { %p2748_p8 = scmp.ne.s32.totalorder %s418_s16, %s2747_s15  ;;  %p2756_p12 = scmp.lt.s32.totalorder %s2747_s15, %s2747_s15 }
  0x61   : > { %p2750_p9 = pnand %p2748_p8, %p2954_p7  ;;  %p2757_p2 = por %p2756_p12, %p2755_p11 }
  0x63   : > { %p2751_p10 = pneg %p2750_p9 }
  0x65   : > { %p2758_p3 = pnand %p2757_p2, %p2751_p10 }
  0x67   : > { %2761 = shalt.err (!%p2758_p3)
}
  0x68   : > { %s3868_s29 = smov 8   ;;  %s3869_s30 = smov 128  }
  0x69   : > { %2596 = dma.hbm_to_vmem [thread:$0]  (!%p2940_p5), %s3842_s3, 4096, %s418_s16, [#allocation5], %s3869_s30, %s3869_s30, %s3868_s29  }
  0x6a   : > { %s2762_s24 = scalar_lea.hbm %s3846_s7, 1024 }
  0x6b   : > { %p2763_p13 = scmp.ne.s32.totalorder %s3846_s7, %s2762_s24  ;;  %p2769_p0 = scmp.lt.u32.totalorder %s2762_s24, %s3846_s7 }
  0x6d   : > { %p2765_p2 = pnand %p2763_p13, %p2954_p7 }
  0x6f   : > { %p2766_p3 = pneg %p2765_p2 }
  0x71   : > { %p2771_p1 = pnand %p2769_p0, %p2766_p3 }
  0x73   : > { %2774 = shalt.err (!%p2771_p1)
}
  0x74   : > { %s2775_s16 = scalar_lea.vmem %s3030_s23, 1024  ;;  %p2783_p9 = scmp.lt.s32.totalorder %s3030_s23, %s3030_s23 }
  0x75   : > { %p2776_p4 = scmp.ne.s32.totalorder %s3030_s23, %s2775_s16  ;;  %p2784_p10 = scmp.lt.s32.totalorder %s2775_s16, %s2775_s16 }
  0x77   : > { %p2778_p6 = pnand %p2776_p4, %p2954_p7  ;;  %p2785_p11 = por %p2784_p10, %p2783_p9 }
  0x79   : > { %p2779_p8 = pneg %p2778_p6 }
  0x7b   : > { %p2786_p12 = pnand %p2785_p11, %p2779_p8 }
  0x7d   : > { %2789 = shalt.err (!%p2786_p12)
}
  0x7e   : > { %s3870_s20 = smov 256   ;;  %p3871_p13 = scmp.ne.s32.totalorder %s3865_s22, 0 }
  0x7f   : > { %2602 = dma.hbm_to_vmem [thread:$0]  (!%p2940_p5), %s3846_s7, 1024, %s3030_s23, [#allocation8], %s3870_s20, %s3870_s20, %s2816_s4  }
  0x80   : > { %494 = sbr.rel (%p3871_p13) target bundleno = 2386 (0x952), region = 80  ;;  %p3872_p7 = scmp.eq.s32.totalorder (!%p3871_p13), %s2923_s21, 0 }
  0x87   : > { %2795 = dma.done.wait (%p3872_p7), [#allocation3], 512   ;;  %p3873_p2 = pmov %p3872_p7 }
  0x89   : > { %2797 = vsyncadd (%p3873_p2), [#allocation3], 4294966784  ;;  %p3874_p3 = pmov %p3873_p2 }
  0x8a   : > { %p3875_p0 = pmov %p3873_p2 }
  0x8b   : > { %2799 = dma.done.wait (%p3874_p3), [#allocation5], 4352  }
  0x8c   : > { %2801 = vsyncadd (%p3875_p0), [#allocation5], 4294962944  ;;  %p3876_p1 = pmov %p3875_p0 }
  0x8d   : > { %p3877_p5 = pmov %p3875_p0 }
  0x8e   : > { %2803 = dma.done.wait (%p3876_p1), [#allocation8], 1280  }
  0x8f   : > { %2805 = vsyncadd (%p3877_p5), [#allocation8], 4294966016  ;;  %p556_p4 = scmp.lt.s32.totalorder %s2923_s21, 1  ;;  %v576_v0 = vlaneseq  ;;  %s2819_s23 = smov 16   ;;  %v3112_v4 = vld [vmem:[#allocation4] sm:$0xff]  ;;  %v2825_v19 = vmov 0.0  }
  0x90   : > { %s2820_s18 = smov 17   ;;  %s2821_s17 = smov 15   ;;  %805 = vmatprep.mubr.f32.mxu0 %v2825_v19  ;;  %v2827_v20 = vmov 0   ;;  %v722_v21 = vld [vmem:[%s3845_s6] sm:$0xff]  ;;  %v723_v22 = vld [vmem:[%s3845_s6 + $0x8] sm:$0xff]  ;;  %vm734_vm8 = vcmask 588800  }
  0x91   : > { %s3883_s21 = smov (!%p556_p4, %s2923_s21), 1  ;;  %v3098_v1 = vshrl.u32 %v576_v0, 7  ;;  %s2822_s26 = smov 1   ;;  %2648 = vset.pattern.permute.xlu0 %v2827_v20  ;;  %2649 = vset.pattern.permute.xlu1 %v2827_v20  ;;  %v3191_v23 = vand.u32 127, %v576_v0  ;;  %v3193_v24 = vld [vmem:[#allocation2] sm:$0xff]  ;;  %v3195_v25 = vld [vmem:[#allocation2 + $0x8] sm:$0xff] }
  0x92   : > { %s2182_s22 = sshll.u32 %s3883_s21, 4  ;;  %s2823_s28 = smov 127   ;;  %vm986_vm9 = vcmask 130048   ;;  %vm1385_vm10 = vcmask 261120   ;;  %vm2836_vm11 = vmmov 0  }
  0x93   : > { %s560_s4 = scalar_lea.vmem %s3839_s0, %s2182_s22  ;;  %v3106_v3 = vsub.s32 2, %v3098_v1  ;;  %v583_v5 = vsub.s32 0, %v3098_v1  ;;  %v600_v6 = vsub.s32 1, %v3098_v1  ;;  %v3123_v9 = vsub.s32 3, %v3098_v1  ;;  %s2824_s24 = smov 113  }
  0x94   : > { %v3103_v2 = vld [vmem:[%s560_s4] sm:$0xff]  ;;  %v3116_v7 = vld [vmem:[%s560_s4 + $0x8] sm:$0xff]  ;;  %v3132_v12 = vsub.s32 5, %v3098_v1  ;;  %v3147_v15 = vsub.s32 6, %v3098_v1  ;;  %v3158_v17 = vsub.s32 7, %v3098_v1  ;;  %s2826_s14 = smov 112  }
  0x95   : > { %591 = vrot.lane.b32.xlu1 %v3103_v2, %s2819_s23  ;;  %572 = vrot.lane.b32.xlu0 %v3103_v2, %s2820_s18  ;;  %v3120_v8 = vrot.slane %v3112_v4, %v3106_v3  ;;  %v3126_v10 = vrot.slane %v3112_v4, %v583_v5  ;;  %v3129_v11 = vrot.slane %v3112_v4, %v600_v6  ;;  %s2828_s27 = smov 111   ;;  %vm595_vm0 = vcmp.lt.s32.totalorder %v3191_v23, 16  ;;  %s2832_s15 = smov 7  }
  0x96   : > { %v3136_v13 = vrot.slane %v3112_v4, %v3123_v9  ;;  %v3144_v14 = vrot.slane %v3112_v4, %v3132_v12  ;;  %v3155_v16 = vrot.slane %v3112_v4, %v3147_v15  ;;  %v3166_v18 = vrot.slane %v3112_v4, %v3158_v17  ;;  %s2833_s16 = smov 120   ;;  %s2834_s30 = smov 119  }
  0x97   : > { %vm578_vm1 = vcmp.lt.s32.totalorder %v3191_v23, 17  ;;  %v3200_v28 = vrot.slane %v3195_v25, %v583_v5  ;;  %v3203_v29 = vrot.slane %v3195_v25, %v600_v6  ;;  %v3206_v30 = vrot.slane %v3193_v24, %v583_v5  ;;  %s3879_s20 = sld [smem:[#allocation15_spill]]  ;;  %s3880_s22 = sld [smem:[#allocation16_spill]] }
  0x98   : > { %v3209_v31 = vrot.slane %v3193_v24, %v600_v6  ;;  %vm612_vm2 = vcmp.lt.s32.totalorder %v3191_v23, 15  ;;  %v3225_v46 = vsub.s32 4, %v3098_v1  ;;  %vm629_vm3 = vcmp.lt.s32.totalorder %v3191_v23, 1 }
  0x99   : > { %593 = vrot.lane.b32.xlu1 %v3116_v7, %s2819_s23  ;;  %574 = vrot.lane.b32.xlu0 %v3116_v7, %s2820_s18  ;;  %v3230_v47 = vrot.slane %v3193_v24, %v3106_v3  ;;  %v3234_v48 = vrot.slane %v3195_v25, %v3106_v3  ;;  %v3238_v49 = vrot.slane %v3193_v24, %v3123_v9  ;;  %vm656_vm4 = vcmp.lt.s32.totalorder %v3191_v23, 127 }
  0x9a   : > { %v3242_v50 = vrot.slane %v3195_v25, %v3123_v9  ;;  %v3251_v55 = vrot.slane %v3195_v25, %v3225_v46  ;;  %v3255_v56 = vrot.slane %v3193_v24, %v3225_v46  ;;  %v3263_v59 = vrot.slane %v3193_v24, %v3132_v12 }
  0x9b   : > { %v3267_v60 = vrot.slane %v3195_v25, %v3132_v12  ;;  %vm673_vm5 = vcmp.lt.s32.totalorder %v3191_v23, 113  ;;  %vm690_vm6 = vcmp.lt.s32.totalorder %v3191_v23, 112  ;;  %vm707_vm7 = vcmp.lt.s32.totalorder %v3191_v23, 111  ;;  %v956_v23 = vld [vmem:[#allocation9 + $0x10] sm:$0xff] }
  0x9c   : > { %v651_v9 = vmul.f32 %v3251_v55, %v3116_v7  ;;  %v650_v20 = vmul.f32 %v3255_v56, %v3103_v2 }
  0x9d   : > { %610 = vrot.lane.b32.xlu1 %v3116_v7, %s2821_s17  ;;  %608 = vrot.lane.b32.xlu0 %v3103_v2, %s2821_s17  ;;  %s563_s25 = scalar_lea.vmem %s3880_s22, %s3883_s21 }
  0xa1   : > { %627 = vrot.lane.b32.xlu1 %v3116_v7, %s2822_s26  ;;  %625 = vrot.lane.b32.xlu0 %v3103_v2, %s2822_s26 }
  0xa5   : > { %654 = vrot.lane.b32.xlu1 %v3116_v7, %s2823_s28  ;;  %652 = vrot.lane.b32.xlu0 %v3103_v2, %s2823_s28 }
  0xa9   : > { %671 = vrot.lane.b32.xlu1 %v3116_v7, %s2824_s24  ;;  %669 = vrot.lane.b32.xlu0 %v3103_v2, %s2824_s24 }
  0xad   : > { %688 = vrot.lane.b32.xlu1 %v3116_v7, %s2826_s14  ;;  %686 = vrot.lane.b32.xlu0 %v3103_v2, %s2826_s14 }
  0xb1   : > { %705 = vrot.lane.b32.xlu1 %v3116_v7, %s2828_s27  ;;  %703 = vrot.lane.b32.xlu0 %v3103_v2, %s2828_s27  ;;  %v3286_v2 = vrot.slane %v3193_v24, %v3147_v15 }
  0xb5   : > { %726 = vperm.xlu0 %2648, %v722_v21   ;;  %731 = vperm.xlu1 %2649, %v723_v22  }
 0x107   : > { %v592_v26 = vpop.permute.xlu1 %591  ;;  %v573_v27 = vpop.permute.xlu0 %572 }
 0x10b   : > { %v594_v32 = vpop.permute.xlu1 %593  ;;  %v575_v33 = vpop.permute.xlu0 %574 }
 0x10c   : > { %v597_v34 = vsel %vm595_vm0, %v594_v32, %v592_v26  ;;  %v580_v35 = vsel %vm578_vm1, %v575_v33, %v573_v27  ;;  %v579_v36 = vsel %vm578_vm1, %v573_v27, %v575_v33  ;;  %v596_v37 = vsel %vm595_vm0, %v592_v26, %v594_v32 }
 0x10d   : > { %v590_v38 = vmul.f32 %v3200_v28, %v579_v36  ;;  %v607_v39 = vmul.f32 %v3203_v29, %v596_v37  ;;  %v589_v40 = vmul.f32 %v3206_v30, %v580_v35  ;;  %v606_v41 = vmul.f32 %v3209_v31, %v597_v34 }
 0x10e   : > { %v3290_v34 = vrot.slane %v3195_v25, %v3147_v15  ;;  %v3295_v35 = vrot.slane %v3193_v24, %v3158_v17  ;;  %v3299_v36 = vrot.slane %v3195_v25, %v3158_v17 }
 0x10f   : > { %v611_v42 = vpop.permute.xlu1 %610  ;;  %v609_v43 = vpop.permute.xlu0 %608  ;;  %v2391_v44 = vpack.c.bf16 %v607_v39, %v590_v38  ;;  %v2393_v45 = vpack.c.bf16 %v606_v41, %v589_v40 }
 0x110   : > { %v613_v51 = vsel %vm612_vm2, %v609_v43, %v611_v42  ;;  %v614_v52 = vsel %vm612_vm2, %v611_v42, %v609_v43  ;;  %v3314_v43 = vld [vmem:[#allocation2 + $0x18] ss:$0 sm:$0xff] }
 0x111   : > { %2392 = vmatprep.subr.bf16.mxu0 %v2391_v44  ;;  %v623_v61 = vmul.f32 %v3230_v47, %v614_v52  ;;  %v624_v62 = vmul.f32 %v3234_v48, %v613_v51 }
 0x112   : > { %2394 = vmatpush1.bf16.msra.mxu0 %v2393_v45 }
 0x113   : > { %v628_v53 = vpop.permute.xlu1 %627  ;;  %v626_v54 = vpop.permute.xlu0 %625 }
 0x114   : > { %v630_v57 = vsel %vm629_vm3, %v626_v54, %v628_v53  ;;  %v631_v58 = vsel %vm629_vm3, %v628_v53, %v626_v54  ;;  %v3316_v53 = vld [vmem:[#allocation2 + $0x10] ss:$0 sm:$0xff] }
 0x115   : > { %v640_v63 = vmul.f32 %v3238_v49, %v631_v58  ;;  %v641_v0 = vmul.f32 %v3242_v50, %v630_v57 }
 0x117   : > { %v655_v1 = vpop.permute.xlu1 %654  ;;  %v653_v3 = vpop.permute.xlu0 %652  ;;  %v2395_v5 = vpack.c.bf16 %v641_v0, %v624_v62  ;;  %v2397_v6 = vpack.c.bf16 %v640_v63, %v623_v61  ;;  %v720_v62 = vld [vmem:[#allocation7] sm:$0xff]  ;;  %v721_v63 = vld [vmem:[#allocation7 + $0x8] sm:$0xff] }
 0x118   : > { %v657_v12 = vsel %vm656_vm4, %v653_v3, %v655_v1  ;;  %v658_v21 = vsel %vm656_vm4, %v655_v1, %v653_v3 }
 0x119   : > { %v667_v22 = vmul.f32 %v3263_v59, %v657_v12  ;;  %v668_v26 = vmul.f32 %v3267_v60, %v658_v21  ;;  %2396 = vmatprep.subr.bf16.mxu0 %v2395_v5 }
 0x11a   : > { %2398 = vmatpush1.bf16.msra.mxu0 %v2397_v6 }
 0x11b   : > { %v672_v27 = vpop.permute.xlu1 %671  ;;  %v670_v32 = vpop.permute.xlu0 %669  ;;  %v2399_v7 = vpack.c.bf16 %v668_v26, %v651_v9  ;;  %v2401_v33 = vpack.c.bf16 %v667_v22, %v650_v20 }
 0x11c   : > { %v674_v37 = vsel %vm673_vm5, %v670_v32, %v672_v27  ;;  %v675_v38 = vsel %vm673_vm5, %v672_v27, %v670_v32 }
 0x11d   : > { %2400 = vmatprep.subr.bf16.mxu0 %v2399_v7  ;;  %v684_v17 = vmul.f32 %v3286_v2, %v674_v37  ;;  %v685_v25 = vmul.f32 %v3290_v34, %v675_v38 }
 0x11e   : > { %2402 = vmatpush1.bf16.msra.mxu0 %v2401_v33 }
 0x11f   : > { %v689_v15 = vpop.permute.xlu1 %688  ;;  %v687_v39 = vpop.permute.xlu0 %686 }
 0x120   : > { %v691_v40 = vsel %vm690_vm6, %v687_v39, %v689_v15  ;;  %v692_v24 = vsel %vm690_vm6, %v689_v15, %v687_v39 }
 0x121   : > { %v701_v41 = vmul.f32 %v3295_v35, %v691_v40  ;;  %v702_v42 = vmul.f32 %v3299_v36, %v692_v24  ;;  %v963_v24 = vld [vmem:[%s3847_s8 + $0x8] sm:$0xff] }
 0x123   : > { %v706_v44 = vpop.permute.xlu1 %705  ;;  %v704_v45 = vpop.permute.xlu0 %703  ;;  %v2403_v51 = vpack.c.bf16 %v702_v42, %v685_v25  ;;  %v2405_v52 = vpack.c.bf16 %v701_v41, %v684_v17  ;;  %v964_v17 = vld [vmem:[%s3847_s8 + $0x10] sm:$0xff]  ;;  %v965_v25 = vld [vmem:[%s3847_s8 + $0x18] sm:$0xff] }
 0x124   : > { %v708_v54 = vsel %vm707_vm7, %v704_v45, %v706_v44  ;;  %v709_v57 = vsel %vm707_vm7, %v706_v44, %v704_v45  ;;  %v1112_v41 = vld [vmem:[#allocation6 + $0x80] sm:$0xff]  ;;  %v1113_v42 = vld [vmem:[#allocation6 + $0x88] sm:$0xff] }
 0x125   : > { %2404 = vmatprep.subr.bf16.mxu0 %v2403_v51  ;;  %v719_v58 = vmul.f32 %v3314_v43, %v709_v57  ;;  %v718_v61 = vmul.f32 %v3316_v53, %v708_v54  ;;  %v1096_v44 = vld [vmem:[#allocation6] sm:$0xff]  ;;  %v2443_v45 = vpack.c.bf16 %v1113_v42, %v1112_v41  ;;  %v1097_v51 = vld [vmem:[#allocation6 + $0x8] sm:$0xff]  ;;  %v1115_v54 = vld [vmem:[#allocation6 + $0x98] sm:$0xff] }
 0x126   : > { %2406 = vmatpush1.bf16.msra.mxu0 %v2405_v52  ;;  %v1114_v52 = vld [vmem:[#allocation6 + $0x90] sm:$0xff]  ;;  %v2445_v57 = vpack.c.bf16 %v1097_v51, %v1096_v44  ;;  %v1124_v51 = vld [vmem:[#allocation6 + $0xe0] sm:$0xff] }
 0x127   : > { %757 = vmatprep.subr.mxu0 %v719_v58  ;;  %v2447_v58 = vpack.c.bf16 %v1115_v54, %v1114_v52  ;;  %v1106_v44 = vld [vmem:[#allocation6 + $0x50] sm:$0xff]  ;;  %v1125_v52 = vld [vmem:[#allocation6 + $0xe8] sm:$0xff] }
 0x12a   : > { %758 = vmatpush1.msra.mxu0 %v718_v61  ;;  %v1098_v61 = vld [vmem:[#allocation6 + $0x10] sm:$0xff] }
 0x12b   : > { %2164 = vmatmul.mubr.msk.f32.vlgmr.msra.gmra.mrb[0].mxu0 %vm734_vm8, %v720_v62  ;;  %v1099_v62 = vld [vmem:[#allocation6 + $0x18] sm:$0xff]  ;;  %2444 = vmatprep.subr.bf16.mxu0 %v2443_v45 }
 0x12c   : > { %811 = vmatprep.mubr.f32.mxu0 %v2825_v19  ;;  %2446 = vmatpush3.bf16.msra.mxu0 %v2445_v57  ;;  %v1107_v45 = vld [vmem:[#allocation6 + $0x58] sm:$0xff]  ;;  %v2467_v57 = vpack.c.bf16 %v1125_v52, %v1124_v51 }
 0x12d   : > { %2448 = vmatprep.subr.bf16.mxu0 %v2447_v58  ;;  %v2465_v54 = vpack.c.bf16 %v1107_v45, %v1106_v44 }
 0x12f   : > { %2165 = vmatmul.mubr.msk.f32.gmra.mrb[2].mxu0 %vm734_vm8, %v721_v63  ;;  %v1116_v63 = vld [vmem:[#allocation6 + $0xa0] sm:$0xff] }
 0x134   : > { %v727_v0 = vpop.permute.xlu0 %726  ;;  %v732_v9 = vpop.permute.xlu1 %731 }
 0x1fe   : > { %v807_v1 = vpop.f32.mrb[0].mxu0 }
 0x1ff   : > { %v808_v3 = vadd.f32 %v807_v1, %v727_v0  ;;  %v809_v5 = vpop.f32.mrb[1].mxu0  ;;  %v2449_v1 = vpack.c.bf16 %v1099_v62, %v1098_v61 }
 0x200   : > { %v810_v6 = vadd.f32 %v809_v5, %v727_v0  ;;  %v1117_v0 = vld [vmem:[#allocation6 + $0xa8] sm:$0xff]  ;;  %v1100_v5 = vld [vmem:[#allocation6 + $0x20] sm:$0xff] }
 0x201   : > { %v818_v20 = vmax.f32 %v808_v3, 0.0  ;;  %v2451_v3 = vpack.c.bf16 %v1117_v0, %v1116_v63  ;;  %2450 = vmatpush3.bf16.msra.mxu0 %v2449_v1 }
 0x202   : > { %v813_v12 = vpop.f32.mrb[2].mxu0  ;;  %v819_v26 = vmax.f32 %v810_v6, 0.0  ;;  %v1101_v6 = vld [vmem:[#allocation6 + $0x28] sm:$0xff] }
 0x203   : > { %v814_v21 = vadd.f32 %v813_v12, %v732_v9  ;;  %v815_v22 = vpop.f32.mrb[3].mxu0  ;;  %822 = vrot.lane.b32.xlu1 %v818_v20, %s2820_s18  ;;  %v3329_v33 = vmul.f32 %v818_v20, %v3255_v56  ;;  %v2453_v12 = vpack.c.bf16 %v1101_v6, %v1100_v5  ;;  %2452 = vmatprep.subr.bf16.mxu0 %v2451_v3 }
 0x204   : > { %v816_v27 = vadd.f32 %v815_v22, %v732_v9  ;;  %v3335_v38 = vmul.f32 %v819_v26, %v3251_v55  ;;  %v1118_v9 = vld [vmem:[#allocation6 + $0xb0] sm:$0xff] }
 0x205   : > { %v820_v32 = vmax.f32 %v814_v21, 0.0  ;;  %v1102_v22 = vld [vmem:[#allocation6 + $0x30] sm:$0xff]  ;;  %2454 = vmatpush3.bf16.msra.mxu0 %v2453_v12 }
 0x206   : > { %v821_v7 = vmax.f32 %v816_v27, 0.0  ;;  %v1120_v27 = vld [vmem:[#allocation6 + $0xc0] sm:$0xff] }
 0x207   : > { %824 = vrot.lane.b32.xlu0 %v820_v32, %s2820_s18  ;;  %838 = vrot.lane.b32.xlu1 %v818_v20, %s2819_s23  ;;  %v3332_v37 = vmul.f32 %v820_v32, %v3255_v56  ;;  %v962_v56 = vld [vmem:[%s3847_s8] sm:$0xff] }
 0x208   : > { %v3338_v15 = vmul.f32 %v821_v7, %v3251_v55  ;;  %v955_v55 = vld [vmem:[#allocation9 + $0x8] sm:$0xff] }
 0x209   : > { %v2425_v39 = vpack.c.bf16 %v3332_v37, %v3329_v33  ;;  %2166 = vmatprep.mubr.msk.f32.mxu1 %vm986_vm9, %v955_v55 }
 0x20a   : > { %v2423_v40 = vpack.c.bf16 %v3338_v15, %v3335_v38 }
 0x20b   : > { %840 = vrot.lane.b32.xlu0 %v820_v32, %s2819_s23  ;;  %854 = vrot.lane.b32.xlu1 %v818_v20, %s2821_s17 }
 0x20f   : > { %856 = vrot.lane.b32.xlu0 %v820_v32, %s2821_s17  ;;  %870 = vrot.lane.b32.xlu1 %v818_v20, %s2822_s26 }
 0x213   : > { %872 = vrot.lane.b32.xlu0 %v820_v32, %s2822_s26  ;;  %890 = vrot.lane.b32.xlu1 %v818_v20, %s2823_s28 }
 0x217   : > { %892 = vrot.lane.b32.xlu0 %v820_v32, %s2823_s28  ;;  %906 = vrot.lane.b32.xlu1 %v818_v20, %s2824_s24 }
 0x21b   : > { %908 = vrot.lane.b32.xlu0 %v820_v32, %s2824_s24  ;;  %922 = vrot.lane.b32.xlu1 %v818_v20, %s2826_s14 }
 0x21f   : > { %924 = vrot.lane.b32.xlu0 %v820_v32, %s2826_s14  ;;  %826 = vrot.lane.b32.xlu1 %v819_v26, %s2820_s18 }
 0x223   : > { %828 = vrot.lane.b32.xlu0 %v821_v7, %s2820_s18  ;;  %842 = vrot.lane.b32.xlu1 %v819_v26, %s2819_s23 }
 0x227   : > { %844 = vrot.lane.b32.xlu0 %v821_v7, %s2819_s23  ;;  %858 = vrot.lane.b32.xlu1 %v819_v26, %s2821_s17 }
 0x22b   : > { %860 = vrot.lane.b32.xlu0 %v821_v7, %s2821_s17  ;;  %874 = vrot.lane.b32.xlu1 %v819_v26, %s2822_s26 }
 0x22f   : > { %876 = vrot.lane.b32.xlu0 %v821_v7, %s2822_s26  ;;  %938 = vrot.lane.b32.xlu1 %v818_v20, %s2828_s27  ;;  %v1119_v20 = vld [vmem:[#allocation6 + $0xb8] sm:$0xff] }
 0x230   : > { %v2455_v21 = vpack.c.bf16 %v1119_v20, %v1118_v9 }
 0x232   : > { %2456 = vmatprep.subr.bf16.mxu0 %v2455_v21 }
 0x233   : > { %940 = vrot.lane.b32.xlu0 %v820_v32, %s2828_s27  ;;  %894 = vrot.lane.b32.xlu1 %v819_v26, %s2823_s28  ;;  %v1121_v32 = vld [vmem:[#allocation6 + $0xc8] sm:$0xff] }
 0x234   : > { %v2459_v55 = vpack.c.bf16 %v1121_v32, %v1120_v27 }
 0x237   : > { %896 = vrot.lane.b32.xlu0 %v821_v7, %s2823_s28  ;;  %910 = vrot.lane.b32.xlu1 %v819_v26, %s2824_s24 }
 0x23b   : > { %912 = vrot.lane.b32.xlu0 %v821_v7, %s2824_s24  ;;  %926 = vrot.lane.b32.xlu1 %v819_v26, %s2826_s14  ;;  %s2829_s24 = smov 9  }
 0x23f   : > { %928 = vrot.lane.b32.xlu0 %v821_v7, %s2826_s14  ;;  %942 = vrot.lane.b32.xlu1 %v819_v26, %s2828_s27  ;;  %v1103_v26 = vld [vmem:[#allocation6 + $0x38] sm:$0xff]  ;;  %s2830_s14 = smov 8  }
 0x243   : > { %944 = vrot.lane.b32.xlu0 %v821_v7, %s2828_s27  ;;  %968 = vperm.xlu1 %2649, %v962_v56   ;;  %v2457_v7 = vpack.c.bf16 %v1103_v26, %v1102_v22  ;;  %v1104_v56 = vld [vmem:[#allocation6 + $0x40] sm:$0xff]  ;;  %s2831_s27 = smov 121  }
 0x245   : > { %2458 = vmatpush3.bf16.msra.mxu0 %v2457_v7 }
 0x246   : > { %2460 = vmatprep.subr.bf16.mxu0 %v2459_v55 }
 0x247   : > { %973 = vperm.xlu0 %2648, %v963_v24   ;;  %978 = vperm.xlu1 %2649, %v964_v17   ;;  %v1105_v24 = vld [vmem:[#allocation6 + $0x48] sm:$0xff]  ;;  %v1122_v17 = vld [vmem:[#allocation6 + $0xd0] sm:$0xff] }
 0x248   : > { %v2461_v41 = vpack.c.bf16 %v1105_v24, %v1104_v56 }
 0x24a   : > { %2462 = vmatpush3.bf16.msra.mxu0 %v2461_v41 }
 0x24b   : > { %983 = vperm.xlu0 %2648, %v965_v25   ;;  %v1123_v25 = vld [vmem:[#allocation6 + $0xd8] sm:$0xff] }
 0x24c   : > { %v2463_v42 = vpack.c.bf16 %v1123_v25, %v1122_v17 }
 0x24e   : > { %2464 = vmatprep.subr.bf16.mxu0 %v2463_v42 }
 0x24f   : > { %2466 = vmatpush3.bf16.msra.mxu0 %v2465_v54 }
 0x250   : > { %2468 = vmatprep.subr.bf16.mxu0 %v2467_v57 }
 0x275   : > { %v823_v58 = vpop.permute.xlu1 %822 }
 0x279   : > { %v825_v61 = vpop.permute.xlu0 %824  ;;  %v839_v62 = vpop.permute.xlu1 %838 }
 0x27d   : > { %v841_v63 = vpop.permute.xlu0 %840  ;;  %v855_v0 = vpop.permute.xlu1 %854 }
 0x281   : > { %v857_v1 = vpop.permute.xlu0 %856  ;;  %v871_v3 = vpop.permute.xlu1 %870 }
 0x285   : > { %v873_v5 = vpop.permute.xlu0 %872  ;;  %v3386_v6 = vpop.permute.xlu1 %890 }
 0x289   : > { %v3388_v9 = vpop.permute.xlu0 %892  ;;  %v3390_v20 = vpop.permute.xlu1 %906 }
 0x28d   : > { %v3392_v12 = vpop.permute.xlu0 %908  ;;  %v3394_v21 = vpop.permute.xlu1 %922 }
 0x291   : > { %v3396_v22 = vpop.permute.xlu0 %924  ;;  %v827_v26 = vpop.permute.xlu1 %826 }
 0x292   : > { %v830_v27 = vsel %vm578_vm1, %v823_v58, %v827_v26  ;;  %v832_v32 = vsel %vm578_vm1, %v827_v26, %v823_v58 }
 0x293   : > { %v834_v17 = vmul.f32 %v832_v32, %v3206_v30  ;;  %v835_v41 = vmul.f32 %v830_v27, %v3200_v28 }
 0x295   : > { %v829_v7 = vpop.permute.xlu0 %828  ;;  %v843_v55 = vpop.permute.xlu1 %842 }
 0x296   : > { %v831_v56 = vsel %vm578_vm1, %v825_v61, %v829_v7  ;;  %v833_v24 = vsel %vm578_vm1, %v829_v7, %v825_v61  ;;  %v846_v44 = vsel %vm595_vm0, %v839_v62, %v843_v55  ;;  %v848_v45 = vsel %vm595_vm0, %v843_v55, %v839_v62 }
 0x297   : > { %v836_v25 = vmul.f32 %v833_v24, %v3206_v30  ;;  %v837_v42 = vmul.f32 %v831_v56, %v3200_v28  ;;  %v850_v61 = vmul.f32 %v848_v45, %v3209_v31  ;;  %v851_v28 = vmul.f32 %v846_v44, %v3203_v29 }
 0x299   : > { %v845_v51 = vpop.permute.xlu0 %844  ;;  %v859_v52 = vpop.permute.xlu1 %858  ;;  %v2407_v54 = vpack.c.bf16 %v837_v42, %v835_v41  ;;  %v2409_v57 = vpack.c.bf16 %v836_v25, %v834_v17 }
 0x29a   : > { %v847_v58 = vsel %vm595_vm0, %v841_v63, %v845_v51  ;;  %v849_v30 = vsel %vm595_vm0, %v845_v51, %v841_v63  ;;  %v862_v62 = vsel %vm612_vm2, %v855_v0, %v859_v52  ;;  %v864_v32 = vsel %vm612_vm2, %v859_v52, %v855_v0 }
 0x29b   : > { %v852_v26 = vmul.f32 %v849_v30, %v3209_v31  ;;  %v853_v27 = vmul.f32 %v847_v58, %v3203_v29  ;;  %2408 = vmatprep.subr.bf16.mxu1 %v2407_v54  ;;  %v866_v29 = vmul.f32 %v864_v32, %v3230_v47  ;;  %v867_v17 = vmul.f32 %v862_v62, %v3234_v48 }
 0x29c   : > { %2410 = vmatpush1.bf16.msra.mxu1 %v2409_v57 }
 0x29d   : > { %v861_v7 = vpop.permute.xlu0 %860  ;;  %v875_v55 = vpop.permute.xlu1 %874  ;;  %v2411_v56 = vpack.c.bf16 %v853_v27, %v851_v28  ;;  %v2413_v63 = vpack.c.bf16 %v852_v26, %v850_v61 }
 0x29e   : > { %v863_v24 = vsel %vm612_vm2, %v857_v1, %v861_v7  ;;  %v865_v31 = vsel %vm612_vm2, %v861_v7, %v857_v1  ;;  %v878_v0 = vsel %vm629_vm3, %v871_v3, %v875_v55  ;;  %v880_v42 = vsel %vm629_vm3, %v875_v55, %v871_v3 }
 0x29f   : > { %v868_v25 = vmul.f32 %v865_v31, %v3230_v47  ;;  %v869_v41 = vmul.f32 %v863_v24, %v3234_v48  ;;  %2412 = vmatprep.subr.bf16.mxu1 %v2411_v56  ;;  %v882_v48 = vmul.f32 %v880_v42, %v3238_v49  ;;  %v883_v54 = vmul.f32 %v878_v0, %v3242_v50 }
 0x2a0   : > { %2414 = vmatpush1.bf16.msra.mxu1 %v2413_v63 }
 0x2a1   : > { %v877_v44 = vpop.permute.xlu0 %876  ;;  %v939_v45 = vpop.permute.xlu1 %938  ;;  %v2415_v51 = vpack.c.bf16 %v869_v41, %v867_v17  ;;  %v2417_v1 = vpack.c.bf16 %v868_v25, %v866_v29 }
 0x2a2   : > { %v879_v52 = vsel %vm629_vm3, %v873_v5, %v877_v44  ;;  %v881_v47 = vsel %vm629_vm3, %v877_v44, %v873_v5 }
 0x2a3   : > { %v884_v57 = vmul.f32 %v881_v47, %v3238_v49  ;;  %v885_v58 = vmul.f32 %v879_v52, %v3242_v50  ;;  %2416 = vmatprep.subr.bf16.mxu1 %v2415_v51 }
 0x2a4   : > { %2418 = vmatpush1.bf16.msra.mxu1 %v2417_v1 }
 0x2a5   : > { %v941_v3 = vpop.permute.xlu0 %940  ;;  %v895_v30 = vpop.permute.xlu1 %894  ;;  %v2419_v61 = vpack.c.bf16 %v885_v58, %v883_v54  ;;  %v2421_v28 = vpack.c.bf16 %v884_v57, %v882_v48 }
 0x2a6   : > { %v898_v26 = vsel %vm656_vm4, %v3386_v6, %v895_v30  ;;  %v900_v5 = vsel %vm656_vm4, %v895_v30, %v3386_v6  ;;  %v954_v30 = vld [vmem:[#allocation9] sm:$0xff] }
 0x2a7   : > { %2420 = vmatprep.subr.bf16.mxu1 %v2419_v61  ;;  %v902_v32 = vmul.f32 %v898_v26, %v3263_v59  ;;  %v903_v7 = vmul.f32 %v900_v5, %v3267_v60  ;;  %v957_v61 = vld [vmem:[#allocation9 + $0x18] sm:$0xff]  ;;  %v1108_v26 = vld [vmem:[#allocation6 + $0x60] sm:$0xff] }
 0x2a8   : > { %2422 = vmatpush1.bf16.msra.mxu1 %v2421_v28  ;;  %v958_v28 = vld [vmem:[#allocation9 + $0x20] sm:$0xff]  ;;  %v1109_v5 = vld [vmem:[#allocation6 + $0x68] sm:$0xff] }
 0x2a9   : > { %v897_v27 = vpop.permute.xlu0 %896  ;;  %2424 = vmatprep.subr.bf16.mxu1 %v2423_v40  ;;  %v911_v49 = vpop.permute.xlu1 %910 }
 0x2aa   : > { %v899_v50 = vsel %vm656_vm4, %v3388_v9, %v897_v27  ;;  %v901_v62 = vsel %vm656_vm4, %v897_v27, %v3388_v9  ;;  %v914_v38 = vsel %vm673_vm5, %v3390_v20, %v911_v49  ;;  %v916_v15 = vsel %vm673_vm5, %v911_v49, %v3390_v20  ;;  %v1126_v49 = vld [vmem:[#allocation6 + $0xf0] sm:$0xff] }
 0x2ab   : > { %v904_v6 = vmul.f32 %v899_v50, %v3263_v59  ;;  %v905_v55 = vmul.f32 %v901_v62, %v3267_v60  ;;  %v918_v24 = vmul.f32 %v914_v38, %v3286_v2  ;;  %v919_v20 = vmul.f32 %v916_v15, %v3290_v34  ;;  %v1127_v50 = vld [vmem:[#allocation6 + $0xf8] sm:$0xff] }
 0x2ac   : > { %2426 = vmatpush1.bf16.msra.mxu1 %v2425_v39  ;;  %v2469_v27 = vpack.c.bf16 %v1109_v5, %v1108_v26  ;;  %v2471_v62 = vpack.c.bf16 %v1127_v50, %v1126_v49  ;;  %v1362_v26 = vld [vmem:[%s3849_s10 + $0x8] sm:$0xff]  ;;  %v1363_v5 = vld [vmem:[%s3849_s10 + $0x10] sm:$0xff] }
 0x2ad   : > { %v913_v40 = vpop.permute.xlu0 %912  ;;  %v927_v9 = vpop.permute.xlu1 %926  ;;  %v2427_v56 = vpack.c.bf16 %v905_v55, %v903_v7  ;;  %v2429_v63 = vpack.c.bf16 %v904_v6, %v902_v32  ;;  %v1110_v32 = vld [vmem:[#allocation6 + $0x70] sm:$0xff]  ;;  %v1111_v7 = vld [vmem:[#allocation6 + $0x78] sm:$0xff] }
 0x2ae   : > { %v915_v59 = vsel %vm673_vm5, %v3392_v12, %v913_v40  ;;  %v917_v60 = vsel %vm673_vm5, %v913_v40, %v3392_v12  ;;  %v930_v37 = vsel %vm690_vm6, %v3394_v21, %v927_v9  ;;  %v932_v39 = vsel %vm690_vm6, %v927_v9, %v3394_v21  ;;  %2470 = vmatpush3.bf16.msra.mxu0 %v2469_v27  ;;  %v1364_v27 = vld [vmem:[%s3849_s10 + $0x18] sm:$0xff] }
 0x2af   : > { %v920_v31 = vmul.f32 %v915_v59, %v3286_v2  ;;  %v921_v33 = vmul.f32 %v917_v60, %v3290_v34  ;;  %2428 = vmatprep.subr.bf16.mxu1 %v2427_v56  ;;  %v934_v41 = vmul.f32 %v930_v37, %v3295_v35  ;;  %v935_v0 = vmul.f32 %v932_v39, %v3299_v36 }
 0x2b0   : > { %2430 = vmatpush1.bf16.msra.mxu1 %v2429_v63  ;;  %v2473_v6 = vpack.c.bf16 %v1111_v7, %v1110_v32  ;;  %2472 = vmatprep.subr.bf16.mxu0 %v2471_v62 }
 0x2b1   : > { %v929_v29 = vpop.permute.xlu0 %928  ;;  %v943_v12 = vpop.permute.xlu1 %942  ;;  %v2431_v17 = vpack.c.bf16 %v921_v33, %v919_v20  ;;  %v2433_v25 = vpack.c.bf16 %v920_v31, %v918_v24 }
 0x2b2   : > { %v931_v2 = vsel %vm690_vm6, %v3396_v22, %v929_v29  ;;  %v933_v34 = vsel %vm690_vm6, %v929_v29, %v3396_v22  ;;  %v946_v44 = vsel %vm707_vm7, %v939_v45, %v943_v12  ;;  %v948_v51 = vsel %vm707_vm7, %v943_v12, %v939_v45  ;;  %2474 = vmatpush3.bf16.msra.mxu0 %v2473_v6 }
 0x2b3   : > { %v936_v42 = vmul.f32 %v931_v2, %v3295_v35  ;;  %v937_v21 = vmul.f32 %v933_v34, %v3299_v36  ;;  %2432 = vmatprep.subr.bf16.mxu1 %v2431_v17  ;;  %v950_v35 = vmul.f32 %v3316_v53, %v946_v44  ;;  %v951_v36 = vmul.f32 %v3314_v43, %v948_v51 }
 0x2b4   : > { %2434 = vmatpush1.bf16.msra.mxu1 %v2433_v25 }
 0x2b5   : > { %v945_v1 = vpop.permute.xlu0 %944  ;;  %v2435_v52 = vpack.c.bf16 %v937_v21, %v935_v0  ;;  %v2437_v47 = vpack.c.bf16 %v936_v42, %v934_v41 }
 0x2b6   : > { %v947_v22 = vsel %vm707_vm7, %v941_v3, %v945_v1  ;;  %v949_v48 = vsel %vm707_vm7, %v945_v1, %v941_v3  ;;  %v959_v3 = vld [vmem:[#allocation9 + $0x28] sm:$0xff] }
 0x2b7   : > { %v952_v54 = vmul.f32 %v3316_v53, %v947_v22  ;;  %v953_v57 = vmul.f32 %v3314_v43, %v949_v48  ;;  %2436 = vmatprep.subr.bf16.mxu1 %v2435_v52  ;;  %v961_v53 = vld [vmem:[#allocation9 + $0x38] sm:$0xff]  ;;  %v960_v43 = vld [vmem:[#allocation9 + $0x30] sm:$0xff]  ;;  %v3519_v48 = vrot.slane %v3112_v4, %v3225_v46 }
 0x2b8   : > { %2438 = vmatpush1.bf16.msra.mxu1 %v2437_v47 }
 0x2b9   : > { %v2439_v45 = vpack.c.bf16 %v953_v57, %v951_v36  ;;  %v2441_v58 = vpack.c.bf16 %v952_v54, %v950_v35 }
 0x2bb   : > { %2440 = vmatprep.subr.bf16.mxu1 %v2439_v45 }
 0x2bc   : > { %2442 = vmatpush1.bf16.msra.mxu1 %v2441_v58 }
 0x2bf   : > { %1064 = vmatmul.mubr.f32.vlgmr.msra.gmra.mrb[0].mxu1 %v954_v30 }
 0x2c0   : > { %2167 = vmatprep.mubr.msk.f32.mxu1 %vm986_vm9, %v957_v61 }
 0x2c2   : > { %v969_v55 = vpop.permute.xlu1 %968 }
 0x2c3   : > { %1070 = vmatmul.mubr.f32.gmra.mrb[2].mxu1 %v956_v23 }
 0x2c4   : > { %2168 = vmatprep.mubr.msk.f32.mxu1 %vm986_vm9, %v959_v3 }
 0x2c6   : > { %v974_v56 = vpop.permute.xlu0 %973  ;;  %v979_v33 = vpop.permute.xlu1 %978 }
 0x2c7   : > { %1076 = vmatmul.mubr.f32.gmra.mrb[4].mxu1 %v958_v28  ;;  %v1350_v28 = vld [vmem:[%s3848_s9 + $0x8] sm:$0xff] }
 0x2c8   : > { %2169 = vmatprep.mubr.msk.f32.mxu1 %vm986_vm9, %v961_v53  ;;  %v1351_v53 = vld [vmem:[%s3848_s9 + $0x10] sm:$0xff] }
 0x2ca   : > { %v984_v2 = vpop.permute.xlu0 %983 }
 0x2cb   : > { %1082 = vmatmul.mubr.f32.gmra.mrb[6].mxu1 %v960_v43  ;;  %v1361_v43 = vld [vmem:[%s3849_s10] sm:$0xff] }
 0x2cc   : > { %1462 = vmatprep.mubr.f32.mxu1 %v1350_v28 }
 0x392   : > { %v1065_v38 = vpop.f32.mrb[0].mxu1 }
 0x393   : > { %v1066_v15 = vadd.f32 %v1065_v38, %v969_v55  ;;  %v1067_v40 = vpop.f32.mrb[1].mxu1 }
 0x394   : > { %v1068_v9 = vadd.f32 %v1067_v40, %v969_v55 }
 0x395   : > { %v1088_v60 = vmax.f32 %v1066_v15, 0.0 }
 0x396   : > { %v1089_v63 = vmax.f32 %v1068_v9, 0.0  ;;  %v1071_v59 = vpop.f32.mrb[2].mxu1 }
 0x397   : > { %v1072_v24 = vadd.f32 %v1071_v59, %v974_v56  ;;  %v1073_v20 = vpop.f32.mrb[3].mxu1 }
 0x398   : > { %v1074_v31 = vadd.f32 %v1073_v20, %v974_v56  ;;  %1192 = vmatprep.mubr.f32.mxu0 %v1089_v63 }
 0x399   : > { %1193 = vmatmul.mubr.f32.vlgmr.msra.gmra.mrb[4].mxu0 %v1088_v60  ;;  %v1090_v29 = vmax.f32 %v1072_v24, 0.0 }
 0x39a   : > { %v1091_v37 = vmax.f32 %v1074_v31, 0.0  ;;  %v1077_v39 = vpop.f32.mrb[4].mxu1 }
 0x39b   : > { %v1078_v12 = vadd.f32 %v1077_v39, %v979_v33  ;;  %v1079_v17 = vpop.f32.mrb[5].mxu1 }
 0x39c   : > { %v1080_v25 = vadd.f32 %v1079_v17, %v979_v33  ;;  %1197 = vmatprep.mubr.f32.mxu0 %v1091_v37 }
 0x39d   : > { %1198 = vmatmul.mubr.f32.gmra.mrb[6].mxu0 %v1090_v29  ;;  %v1092_v0 = vmax.f32 %v1078_v12, 0.0 }
 0x39e   : > { %v1093_v34 = vmax.f32 %v1080_v25, 0.0  ;;  %v1083_v41 = vpop.f32.mrb[6].mxu1 }
 0x39f   : > { %v1084_v42 = vadd.f32 %v1083_v41, %v984_v2  ;;  %v1085_v21 = vpop.f32.mrb[7].mxu1 }
 0x3a0   : > { %v1086_v44 = vadd.f32 %v1085_v21, %v984_v2  ;;  %1202 = vmatprep.mubr.f32.mxu0 %v1093_v34 }
 0x3a1   : > { %1203 = vmatmul.mubr.f32.gmra.mrb[8].mxu0 %v1092_v0  ;;  %v1094_v1 = vmax.f32 %v1084_v42, 0.0 }
 0x3a2   : > { %v1095_v51 = vmax.f32 %v1086_v44, 0.0 }
 0x3a4   : > { %1207 = vmatprep.mubr.f32.mxu0 %v1095_v51 }
 0x3a5   : > { %1208 = vmatmul.mubr.f32.gmra.mrb[10].mxu0 %v1094_v1 }
 0x3a6   : > { %2349 = vmatprep.mubr.msk.f32.mxu0 %vm1385_vm10, %v1351_v53 }
 0x46c   : > { %v2215_v52 = vpop.f32.mrb[4].mxu0 }
 0x46d   : > { %v2216_v47 = vpop.f32.mrb[5].mxu0 }
 0x46e   : > { %v3515_v22 = vadd.f32 %v2216_v47, %v2215_v52 }
 0x470   : > { %v2218_v35 = vpop.f32.mrb[6].mxu0  ;;  %1213 = vrot.lane.b32.xlu1 %v3515_v22, %s2829_s24  ;;  %v1281_v45 = vmul.f32 %v3515_v22, %v3519_v48 }
 0x471   : > { %v2219_v36 = vpop.f32.mrb[7].mxu0 }
 0x472   : > { %v3523_v54 = vadd.f32 %v2219_v36, %v2218_v35 }
 0x474   : > { %v2221_v57 = vpop.f32.mrb[8].mxu0  ;;  %1215 = vrot.lane.b32.xlu0 %v3523_v54, %s2829_s24  ;;  %1285 = vrot.lane.b32.xlu1 %v3515_v22, %s2823_s28  ;;  %v1282_v4 = vmul.f32 %v3523_v54, %v3519_v48 }
 0x475   : > { %v2222_v46 = vpop.f32.mrb[9].mxu0 }
 0x476   : > { %v3533_v58 = vadd.f32 %v2222_v46, %v2221_v57  ;;  %v2475_v30 = vpack.c.bf16 %v1282_v4, %v1281_v45 }
 0x478   : > { %v2224_v61 = vpop.f32.mrb[10].mxu0  ;;  %1287 = vrot.lane.b32.xlu0 %v3523_v54, %s2823_s28  ;;  %1229 = vrot.lane.b32.xlu1 %v3515_v22, %s2830_s14  ;;  %v1283_v55 = vmul.f32 %v3533_v58, %v3519_v48 }
 0x479   : > { %2476 = vmatprep.subr.bf16.mxu1 %v2475_v30  ;;  %v2225_v23 = vpop.f32.mrb[11].mxu0 }
 0x47a   : > { %v3539_v3 = vadd.f32 %v2225_v23, %v2224_v61 }
 0x47c   : > { %1231 = vrot.lane.b32.xlu0 %v3523_v54, %s2830_s14  ;;  %1301 = vrot.lane.b32.xlu1 %v3515_v22, %s2831_s27  ;;  %v1284_v32 = vmul.f32 %v3539_v3, %v3519_v48 }
 0x47e   : > { %v2479_v9 = vpack.c.bf16 %v1284_v32, %v1283_v55 }
 0x480   : > { %1303 = vrot.lane.b32.xlu0 %v3523_v54, %s2831_s27  ;;  %1245 = vrot.lane.b32.xlu1 %v3515_v22, %s2832_s15 }
 0x484   : > { %1247 = vrot.lane.b32.xlu0 %v3523_v54, %s2832_s15  ;;  %1317 = vrot.lane.b32.xlu1 %v3515_v22, %s2833_s16 }
 0x488   : > { %1319 = vrot.lane.b32.xlu0 %v3523_v54, %s2833_s16  ;;  %1261 = vrot.lane.b32.xlu1 %v3515_v22, %s2822_s26 }
 0x48c   : > { %1263 = vrot.lane.b32.xlu0 %v3523_v54, %s2822_s26  ;;  %1217 = vrot.lane.b32.xlu1 %v3533_v58, %s2829_s24 }
 0x490   : > { %1219 = vrot.lane.b32.xlu0 %v3539_v3, %s2829_s24  ;;  %1289 = vrot.lane.b32.xlu1 %v3533_v58, %s2823_s28 }
 0x494   : > { %1291 = vrot.lane.b32.xlu0 %v3539_v3, %s2823_s28  ;;  %1233 = vrot.lane.b32.xlu1 %v3533_v58, %s2830_s14 }
 0x498   : > { %1235 = vrot.lane.b32.xlu0 %v3539_v3, %s2830_s14  ;;  %1305 = vrot.lane.b32.xlu1 %v3533_v58, %s2831_s27 }
 0x49c   : > { %1307 = vrot.lane.b32.xlu0 %v3539_v3, %s2831_s27  ;;  %1249 = vrot.lane.b32.xlu1 %v3533_v58, %s2832_s15 }
 0x4a0   : > { %1251 = vrot.lane.b32.xlu0 %v3539_v3, %s2832_s15  ;;  %1321 = vrot.lane.b32.xlu1 %v3533_v58, %s2833_s16 }
 0x4a4   : > { %1323 = vrot.lane.b32.xlu0 %v3539_v3, %s2833_s16  ;;  %1265 = vrot.lane.b32.xlu1 %v3533_v58, %s2822_s26 }
 0x4a8   : > { %1267 = vrot.lane.b32.xlu0 %v3539_v3, %s2822_s26  ;;  %1333 = vrot.lane.b32.xlu1 %v3515_v22, %s2834_s30 }
 0x4ac   : > { %1335 = vrot.lane.b32.xlu0 %v3523_v54, %s2834_s30  ;;  %1337 = vrot.lane.b32.xlu1 %v3533_v58, %s2834_s30 }
 0x4b0   : > { %1339 = vrot.lane.b32.xlu0 %v3539_v3, %s2834_s30  ;;  %1367 = vperm.xlu1 %2649, %v1361_v43  }
 0x4b4   : > { %1372 = vperm.xlu0 %2648, %v1362_v26   ;;  %1377 = vperm.xlu1 %2649, %v1363_v5  }
 0x4b8   : > { %1382 = vperm.xlu0 %2648, %v1364_v27  }
 0x4e2   : > { %v1214_v49 = vpop.permute.xlu1 %1213 }
 0x4e3   : > { %v1225_v7 = vmul.f32 %v3126_v10, %v1214_v49 }
 0x4e6   : > { %v1216_v50 = vpop.permute.xlu0 %1215  ;;  %v1286_v62 = vpop.permute.xlu1 %1285 }
 0x4e7   : > { %v1226_v6 = vmul.f32 %v3126_v10, %v1216_v50  ;;  %v1297_v34 = vmul.f32 %v3144_v14, %v1286_v62 }
 0x4e9   : > { %v2477_v38 = vpack.c.bf16 %v1226_v6, %v1225_v7 }
 0x4ea   : > { %v1288_v15 = vpop.permute.xlu0 %1287  ;;  %v1230_v40 = vpop.permute.xlu1 %1229 }
 0x4eb   : > { %2478 = vmatpush3.bf16.msra.mxu1 %v2477_v38  ;;  %v1298_v29 = vmul.f32 %v3144_v14, %v1288_v15  ;;  %v1241_v51 = vmul.f32 %v3129_v11, %v1230_v40 }
 0x4ec   : > { %2480 = vmatprep.subr.bf16.mxu1 %v2479_v9 }
 0x4ed   : > { %v2483_v42 = vpack.c.bf16 %v1298_v29, %v1297_v34 }
 0x4ee   : > { %v1232_v56 = vpop.permute.xlu0 %1231  ;;  %v1302_v63 = vpop.permute.xlu1 %1301 }
 0x4ef   : > { %v1242_v41 = vmul.f32 %v3129_v11, %v1232_v56  ;;  %v1313_v30 = vmul.f32 %v3155_v16, %v1302_v63 }
 0x4f1   : > { %v2485_v47 = vpack.c.bf16 %v1242_v41, %v1241_v51  ;;  %v1349_v41 = vld [vmem:[%s3848_s9] sm:$0xff] }
 0x4f2   : > { %v1304_v59 = vpop.permute.xlu0 %1303  ;;  %v1246_v60 = vpop.permute.xlu1 %1245 }
 0x4f3   : > { %v1314_v36 = vmul.f32 %v3155_v16, %v1304_v59  ;;  %v1257_v26 = vmul.f32 %v3120_v8, %v1246_v60 }
 0x4f5   : > { %v2491_v28 = vpack.c.bf16 %v1314_v36, %v1313_v30  ;;  %v1355_v36 = vld [vmem:[%s3848_s9 + $0x30] sm:$0xff]  ;;  %v1360_v30 = vld [vmem:[%s3848_s9 + $0x58] sm:$0xff] }
 0x4f6   : > { %v1248_v24 = vpop.permute.xlu0 %1247  ;;  %v1318_v20 = vpop.permute.xlu1 %1317 }
 0x4f7   : > { %v1258_v61 = vmul.f32 %v3120_v8, %v1248_v24  ;;  %v1329_v38 = vmul.f32 %v3166_v18, %v1318_v20 }
 0x4f9   : > { %v2493_v49 = vpack.c.bf16 %v1258_v61, %v1257_v26 }
 0x4fa   : > { %v1320_v31 = vpop.permute.xlu0 %1319  ;;  %v1262_v33 = vpop.permute.xlu1 %1261 }
 0x4fb   : > { %v1330_v62 = vmul.f32 %v3166_v18, %v1320_v31  ;;  %v1273_v59 = vmul.f32 %v3136_v13, %v1262_v33 }
 0x4fd   : > { %v2499_v9 = vpack.c.bf16 %v1330_v62, %v1329_v38 }
 0x4fe   : > { %v1264_v37 = vpop.permute.xlu0 %1263  ;;  %v1218_v39 = vpop.permute.xlu1 %1217 }
 0x4ff   : > { %v1227_v25 = vmul.f32 %v3126_v10, %v1218_v39  ;;  %v1274_v15 = vmul.f32 %v3136_v13, %v1264_v37 }
 0x501   : > { %v2501_v31 = vpack.c.bf16 %v1274_v15, %v1273_v59 }
 0x502   : > { %v1220_v12 = vpop.permute.xlu0 %1219  ;;  %v1290_v17 = vpop.permute.xlu1 %1289 }
 0x503   : > { %v1228_v2 = vmul.f32 %v3126_v10, %v1220_v12  ;;  %v1299_v1 = vmul.f32 %v3144_v14, %v1290_v17  ;;  %v3646_v17 = vld [vmem:[#allocation4 + $0x8] ss:$0 sm:$0xff] }
 0x505   : > { %v2481_v0 = vpack.c.bf16 %v1228_v2, %v1227_v25 }
 0x506   : > { %v1292_v21 = vpop.permute.xlu0 %1291  ;;  %v1234_v44 = vpop.permute.xlu1 %1233 }
 0x507   : > { %v1300_v52 = vmul.f32 %v3144_v14, %v1292_v21  ;;  %2482 = vmatpush3.bf16.msra.mxu1 %v2481_v0  ;;  %v1243_v4 = vmul.f32 %v3129_v11, %v1234_v44 }
 0x508   : > { %2484 = vmatprep.subr.bf16.mxu1 %v2483_v42  ;;  %v1353_v42 = vld [vmem:[%s3848_s9 + $0x20] sm:$0xff] }
 0x509   : > { %v2487_v35 = vpack.c.bf16 %v1300_v52, %v1299_v1  ;;  %v1352_v52 = vld [vmem:[%s3848_s9 + $0x18] sm:$0xff] }
 0x50a   : > { %v1236_v57 = vpop.permute.xlu0 %1235  ;;  %v1306_v45 = vpop.permute.xlu1 %1305 }
 0x50b   : > { %v1244_v46 = vmul.f32 %v3129_v11, %v1236_v57  ;;  %2486 = vmatpush3.bf16.msra.mxu1 %v2485_v47  ;;  %v1315_v5 = vmul.f32 %v3155_v16, %v1306_v45  ;;  %v1356_v47 = vld [vmem:[%s3848_s9 + $0x38] sm:$0xff]  ;;  %v1354_v57 = vld [vmem:[%s3848_s9 + $0x28] sm:$0xff]  ;;  %v1359_v45 = vld [vmem:[%s3848_s9 + $0x50] sm:$0xff] }
 0x50c   : > { %2488 = vmatprep.subr.bf16.mxu1 %v2487_v35 }
 0x50d   : > { %v2489_v23 = vpack.c.bf16 %v1244_v46, %v1243_v4  ;;  %v1357_v4 = vld [vmem:[%s3848_s9 + $0x40] sm:$0xff]  ;;  %v1358_v46 = vld [vmem:[%s3848_s9 + $0x48] sm:$0xff] }
 0x50e   : > { %v1308_v53 = vpop.permute.xlu0 %1307  ;;  %v1250_v43 = vpop.permute.xlu1 %1249 }
 0x50f   : > { %v1316_v27 = vmul.f32 %v3155_v16, %v1308_v53  ;;  %2490 = vmatpush3.bf16.msra.mxu1 %v2489_v23  ;;  %v1259_v6 = vmul.f32 %v3120_v8, %v1250_v43 }
 0x510   : > { %2492 = vmatprep.subr.bf16.mxu1 %v2491_v28 }
 0x511   : > { %v2495_v50 = vpack.c.bf16 %v1316_v27, %v1315_v5 }
 0x512   : > { %v1252_v32 = vpop.permute.xlu0 %1251  ;;  %v1322_v7 = vpop.permute.xlu1 %1321 }
 0x513   : > { %v1260_v55 = vmul.f32 %v3120_v8, %v1252_v32  ;;  %2494 = vmatpush3.bf16.msra.mxu1 %v2493_v49  ;;  %v1331_v60 = vmul.f32 %v3166_v18, %v1322_v7 }
 0x514   : > { %2496 = vmatprep.subr.bf16.mxu1 %v2495_v50 }
 0x515   : > { %v2497_v40 = vpack.c.bf16 %v1260_v55, %v1259_v6 }
 0x516   : > { %v1324_v56 = vpop.permute.xlu0 %1323  ;;  %v1266_v63 = vpop.permute.xlu1 %1265 }
 0x517   : > { %v1332_v24 = vmul.f32 %v3166_v18, %v1324_v56  ;;  %2498 = vmatpush3.bf16.msra.mxu1 %v2497_v40  ;;  %v1275_v20 = vmul.f32 %v3136_v13, %v1266_v63 }
 0x518   : > { %2500 = vmatprep.subr.bf16.mxu1 %v2499_v9 }
 0x519   : > { %v2503_v39 = vpack.c.bf16 %v1332_v24, %v1331_v60 }
 0x51a   : > { %v1268_v29 = vpop.permute.xlu0 %1267  ;;  %v1334_v12 = vpop.permute.xlu1 %1333 }
 0x51b   : > { %v1276_v37 = vmul.f32 %v3136_v13, %v1268_v29  ;;  %2502 = vmatpush3.bf16.msra.mxu1 %v2501_v31  ;;  %v1345_v2 = vmul.f32 %v3646_v17, %v1334_v12 }
 0x51c   : > { %2504 = vmatprep.subr.bf16.mxu1 %v2503_v39 }
 0x51d   : > { %v2505_v25 = vpack.c.bf16 %v1276_v37, %v1275_v20 }
 0x51e   : > { %v1336_v33 = vpop.permute.xlu0 %1335  ;;  %v1338_v0 = vpop.permute.xlu1 %1337 }
 0x51f   : > { %v1346_v34 = vmul.f32 %v3646_v17, %v1336_v33  ;;  %2506 = vmatpush3.bf16.msra.mxu1 %v2505_v25  ;;  %v1347_v51 = vmul.f32 %v3646_v17, %v1338_v0 }
 0x521   : > { %v2507_v21 = vpack.c.bf16 %v1346_v34, %v1345_v2 }
 0x522   : > { %v1340_v44 = vpop.permute.xlu0 %1339  ;;  %1463 = vmatmul.mubr.f32.vlgmr.msra.gmra.mrb[8].mxu1 %v1349_v41 }
 0x523   : > { %v1348_v1 = vmul.f32 %v3646_v17, %v1340_v44  ;;  %2508 = vmatprep.subr.bf16.mxu0 %v2507_v21  ;;  %1467 = vmatprep.mubr.f32.mxu1 %v1353_v42  ;;  %v1674_v44 = vld [vmem:[%s3850_s11 + $0x10] sm:$0xff] }
 0x524   : > { %2510 = vmatpush3.bf16.msra.mxu0 %v2507_v21 }
 0x525   : > { %v2511_v35 = vpack.c.bf16 %v1348_v1, %v1347_v51  ;;  %v1685_v51 = vld [vmem:[%s3851_s12 + $0x8] sm:$0xff]  ;;  %v1684_v1 = vld [vmem:[%s3851_s12] sm:$0xff] }
 0x526   : > { %1468 = vmatmul.mubr.f32.gmra.mrb[10].mxu1 %v1352_v52  ;;  %v1687_v52 = vld [vmem:[%s3851_s12 + $0x18] sm:$0xff] }
 0x527   : > { %2512 = vmatprep.subr.bf16.mxu0 %v2511_v35  ;;  %1472 = vmatprep.mubr.f32.mxu1 %v1356_v47  ;;  %v1686_v47 = vld [vmem:[%s3851_s12 + $0x10] sm:$0xff] }
 0x528   : > { %2514 = vmatpush3.bf16.msra.mxu0 %v2511_v35 }
 0x52a   : > { %1473 = vmatmul.mubr.f32.gmra.mrb[12].mxu1 %v1355_v36 }
 0x52b   : > { %2350 = vmatmul.mubr.msk.f32.vlgmr.msra.gmra.mrb[12].mxu0 %vm1385_vm10, %v1354_v57  ;;  %1477 = vmatprep.mubr.f32.mxu1 %v1359_v45 }
 0x52c   : > { %2352 = vmatprep.mubr.msk.f32.mxu0 %vm1385_vm10, %v1357_v4 }
 0x52e   : > { %1478 = vmatmul.mubr.f32.gmra.mrb[14].mxu1 %v1358_v46 }
 0x52f   : > { %2353 = vmatmul.mubr.msk.f32.gmra.mrb[14].mxu0 %vm1385_vm10, %v1360_v30  ;;  %v1368_v43 = vpop.permute.xlu1 %1367  ;;  %2363 = vmatprep.mubr.msk.f32.mxu1 %vm1385_vm10, %v1674_v44 }
 0x533   : > { %v1373_v27 = vpop.permute.xlu0 %1372  ;;  %v1378_v15 = vpop.permute.xlu1 %1377 }
 0x537   : > { %v1383_v12 = vpop.permute.xlu0 %1382 }
 0x5f5   : > { %v2259_v61 = vpop.f32.mrb[8].mxu1 }
 0x5f6   : > { %v2260_v23 = vpop.f32.mrb[9].mxu1 }
 0x5f7   : > { %v2261_v28 = vadd.f32 %v2260_v23, %v2259_v61 }
 0x5f9   : > { %v2262_v53 = vpop.f32.mrb[10].mxu1  ;;  %v1465_v7 = vadd.f32 %v2261_v28, %v1368_v43 }
 0x5fa   : > { %v2263_v26 = vpop.f32.mrb[11].mxu1 }
 0x5fb   : > { %v2264_v5 = vadd.f32 %v2263_v26, %v2262_v53 }
 0x5fd   : > { %v2265_v49 = vpop.f32.mrb[12].mxu1  ;;  %v1470_v50 = vadd.f32 %v2264_v5, %v1373_v27 }
 0x5fe   : > { %v2266_v62 = vpop.f32.mrb[13].mxu1  ;;  %v2351_v32 = vpop.f32.mrb[12].mxu0 }
 0x5ff   : > { %v2267_v6 = vadd.f32 %v2266_v62, %v2265_v49  ;;  %v1555_v55 = vadd.f32 %v2351_v32, %v1470_v50  ;;  %v1549_v38 = vpop.f32.mrb[13].mxu0 }
 0x600   : > { %v1550_v40 = vadd.f32 %v1549_v38, %v1465_v7 }
 0x601   : > { %v1569_v9 = vmax.f32 %v1555_v55, 0.0  ;;  %v2268_v56 = vpop.f32.mrb[14].mxu1  ;;  %v1475_v63 = vadd.f32 %v2267_v6, %v1378_v15 }
 0x602   : > { %v1568_v59 = vmax.f32 %v1550_v40, 0.0  ;;  %v2269_v60 = vpop.f32.mrb[15].mxu1  ;;  %v2354_v24 = vpop.f32.mrb[14].mxu0 }
 0x603   : > { %v2270_v31 = vadd.f32 %v2269_v60, %v2268_v56  ;;  %v1559_v39 = vpop.f32.mrb[15].mxu0  ;;  %1574 = vrot.lane.b32.xlu0 %v1569_v9, %s2829_s24  ;;  %v1621_v29 = vmul.f32 %v1569_v9, %v3519_v48 }
 0x604   : > { %v1560_v20 = vadd.f32 %v1559_v39, %v1475_v63  ;;  %1572 = vrot.lane.b32.xlu1 %v1568_v59, %s2829_s24  ;;  %v1620_v37 = vmul.f32 %v1568_v59, %v3519_v48 }
 0x605   : > { %v1480_v25 = vadd.f32 %v2270_v31, %v1383_v12 }
 0x606   : > { %v2515_v33 = vpack.c.bf16 %v1621_v29, %v1620_v37  ;;  %v1570_v34 = vmax.f32 %v1560_v20, 0.0 }
 0x607   : > { %v1565_v2 = vadd.f32 %v2354_v24, %v1480_v25  ;;  %1626 = vrot.lane.b32.xlu0 %v1569_v9, %s2823_s28 }
 0x608   : > { %1624 = vrot.lane.b32.xlu1 %v1568_v59, %s2823_s28  ;;  %2516 = vmatprep.subr.bf16.mxu0 %v2515_v33  ;;  %v1622_v0 = vmul.f32 %v1570_v34, %v3519_v48 }
 0x609   : > { %v1571_v41 = vmax.f32 %v1565_v2, 0.0 }
 0x60b   : > { %1586 = vrot.lane.b32.xlu0 %v1569_v9, %s2830_s14  ;;  %v1623_v42 = vmul.f32 %v1571_v41, %v3519_v48  ;;  %v1673_v48 = vld [vmem:[%s3850_s11 + $0x8] sm:$0xff] }
 0x60c   : > { %1584 = vrot.lane.b32.xlu1 %v1568_v59, %s2830_s14  ;;  %1784 = vmatprep.mubr.f32.mxu0 %v1673_v48 }
 0x60d   : > { %v2519_v21 = vpack.c.bf16 %v1623_v42, %v1622_v0 }
 0x60f   : > { %1638 = vrot.lane.b32.xlu0 %v1569_v9, %s2831_s27 }
 0x610   : > { %1636 = vrot.lane.b32.xlu1 %v1568_v59, %s2831_s27 }
 0x613   : > { %1598 = vrot.lane.b32.xlu0 %v1569_v9, %s2832_s15 }
 0x614   : > { %1596 = vrot.lane.b32.xlu1 %v1568_v59, %s2832_s15 }
 0x617   : > { %1650 = vrot.lane.b32.xlu0 %v1569_v9, %s2833_s16 }
 0x618   : > { %1648 = vrot.lane.b32.xlu1 %v1568_v59, %s2833_s16 }
 0x61b   : > { %1610 = vrot.lane.b32.xlu0 %v1569_v9, %s2822_s26 }
 0x61c   : > { %1608 = vrot.lane.b32.xlu1 %v1568_v59, %s2822_s26 }
 0x61f   : > { %1578 = vrot.lane.b32.xlu0 %v1571_v41, %s2829_s24 }
 0x620   : > { %1576 = vrot.lane.b32.xlu1 %v1570_v34, %s2829_s24 }
 0x623   : > { %1630 = vrot.lane.b32.xlu0 %v1571_v41, %s2823_s28 }
 0x624   : > { %1628 = vrot.lane.b32.xlu1 %v1570_v34, %s2823_s28 }
 0x627   : > { %1590 = vrot.lane.b32.xlu0 %v1571_v41, %s2830_s14 }
 0x628   : > { %1588 = vrot.lane.b32.xlu1 %v1570_v34, %s2830_s14  ;;  %s3878_s14 = sld [smem:[#allocation14_spill]] }
 0x62b   : > { %1642 = vrot.lane.b32.xlu0 %v1571_v41, %s2831_s27 }
 0x62c   : > { %1640 = vrot.lane.b32.xlu1 %v1570_v34, %s2831_s27 }
 0x62f   : > { %1602 = vrot.lane.b32.xlu0 %v1571_v41, %s2832_s15 }
 0x630   : > { %1600 = vrot.lane.b32.xlu1 %v1570_v34, %s2832_s15 }
 0x633   : > { %1654 = vrot.lane.b32.xlu0 %v1571_v41, %s2833_s16 }
 0x634   : > { %1652 = vrot.lane.b32.xlu1 %v1570_v34, %s2833_s16 }
 0x637   : > { %1614 = vrot.lane.b32.xlu0 %v1571_v41, %s2822_s26 }
 0x638   : > { %1612 = vrot.lane.b32.xlu1 %v1570_v34, %s2822_s26 }
 0x63b   : > { %1662 = vrot.lane.b32.xlu0 %v1569_v9, %s2834_s30 }
 0x63c   : > { %1660 = vrot.lane.b32.xlu1 %v1568_v59, %s2834_s30 }
 0x63f   : > { %1666 = vrot.lane.b32.xlu0 %v1571_v41, %s2834_s30 }
 0x640   : > { %1664 = vrot.lane.b32.xlu1 %v1570_v34, %s2834_s30 }
 0x643   : > { %1695 = vperm.xlu0 %2648, %v1685_v51  }
 0x644   : > { %1690 = vperm.xlu1 %2649, %v1684_v1  }
 0x647   : > { %1705 = vperm.xlu0 %2648, %v1687_v52  }
 0x648   : > { %1700 = vperm.xlu1 %2649, %v1686_v47  }
 0x675   : > { %v1575_v35 = vpop.permute.xlu0 %1574 }
 0x676   : > { %v1581_v36 = vmul.f32 %v1575_v35, %v3126_v10  ;;  %v1573_v57 = vpop.permute.xlu1 %1572 }
 0x677   : > { %v1580_v45 = vmul.f32 %v1573_v57, %v3126_v10 }
 0x679   : > { %v2517_v4 = vpack.c.bf16 %v1581_v36, %v1580_v45  ;;  %v1627_v46 = vpop.permute.xlu0 %1626 }
 0x67a   : > { %v1625_v30 = vpop.permute.xlu1 %1624  ;;  %v1633_v32 = vmul.f32 %v1627_v46, %v3144_v14 }
 0x67b   : > { %2518 = vmatpush3.bf16.msra.mxu0 %v2517_v4  ;;  %v1632_v7 = vmul.f32 %v1625_v30, %v3144_v14 }
 0x67c   : > { %2520 = vmatprep.subr.bf16.mxu0 %v2519_v21 }
 0x67d   : > { %v1587_v61 = vpop.permute.xlu0 %1586  ;;  %v2523_v63 = vpack.c.bf16 %v1633_v32, %v1632_v7  ;;  %v1676_v32 = vld [vmem:[%s3850_s11 + $0x20] sm:$0xff] }
 0x67e   : > { %v1585_v23 = vpop.permute.xlu1 %1584  ;;  %v1593_v15 = vmul.f32 %v1587_v61, %v3129_v11 }
 0x67f   : > { %v1592_v40 = vmul.f32 %v1585_v23, %v3129_v11 }
 0x681   : > { %v1639_v28 = vpop.permute.xlu0 %1638  ;;  %v2525_v31 = vpack.c.bf16 %v1593_v15, %v1592_v40  ;;  %v1675_v15 = vld [vmem:[%s3850_s11 + $0x18] sm:$0xff] }
 0x682   : > { %v1637_v53 = vpop.permute.xlu1 %1636  ;;  %v1645_v12 = vmul.f32 %v1639_v28, %v3155_v16  ;;  %v1679_v40 = vld [vmem:[%s3850_s11 + $0x38] sm:$0xff] }
 0x685   : > { %v1599_v43 = vpop.permute.xlu0 %1598 }
 0x686   : > { %v1597_v26 = vpop.permute.xlu1 %1596  ;;  %v1605_v33 = vmul.f32 %v1599_v43, %v3120_v8 }
 0x689   : > { %v1651_v5 = vpop.permute.xlu0 %1650 }
 0x68a   : > { %v1649_v27 = vpop.permute.xlu1 %1648 }
 0x68b   : > { %v1656_v1 = vmul.f32 %v1649_v27, %v3166_v18 }
 0x68d   : > { %v1611_v49 = vpop.permute.xlu0 %1610 }
 0x68e   : > { %v1609_v50 = vpop.permute.xlu1 %1608  ;;  %v1617_v36 = vmul.f32 %v1611_v49, %v3136_v13 }
 0x691   : > { %v1579_v62 = vpop.permute.xlu0 %1578 }
 0x692   : > { %v1583_v6 = vmul.f32 %v1579_v62, %v3126_v10  ;;  %v1577_v55 = vpop.permute.xlu1 %1576 }
 0x693   : > { %v1582_v38 = vmul.f32 %v1577_v55, %v3126_v10  ;;  %v1644_v10 = vmul.f32 %v1637_v53, %v3155_v16 }
 0x695   : > { %v2521_v9 = vpack.c.bf16 %v1583_v6, %v1582_v38  ;;  %v1631_v56 = vpop.permute.xlu0 %1630  ;;  %v2531_v41 = vpack.c.bf16 %v1645_v12, %v1644_v10 }
 0x696   : > { %v1635_v59 = vmul.f32 %v1631_v56, %v3144_v14  ;;  %v1629_v60 = vpop.permute.xlu1 %1628  ;;  %v1678_v56 = vld [vmem:[%s3850_s11 + $0x30] sm:$0xff] }
 0x697   : > { %v1634_v24 = vmul.f32 %v1629_v60, %v3144_v14  ;;  %2522 = vmatpush3.bf16.msra.mxu0 %v2521_v9  ;;  %v1604_v14 = vmul.f32 %v1597_v26, %v3120_v8  ;;  %v1681_v60 = vld [vmem:[%s3850_s11 + $0x48] sm:$0xff] }
 0x698   : > { %2524 = vmatprep.subr.bf16.mxu0 %v2523_v63  ;;  %v1682_v63 = vld [vmem:[%s3850_s11 + $0x50] sm:$0xff] }
 0x699   : > { %v2527_v39 = vpack.c.bf16 %v1635_v59, %v1634_v24  ;;  %v1591_v29 = vpop.permute.xlu0 %1590  ;;  %v2533_v48 = vpack.c.bf16 %v1605_v33, %v1604_v14  ;;  %v1680_v59 = vld [vmem:[%s3850_s11 + $0x40] sm:$0xff]  ;;  %v1683_v24 = vld [vmem:[%s3850_s11 + $0x58] sm:$0xff] }
 0x69a   : > { %v1595_v20 = vmul.f32 %v1591_v29, %v3129_v11  ;;  %v1589_v37 = vpop.permute.xlu1 %1588 }
 0x69b   : > { %v1594_v25 = vmul.f32 %v1589_v37, %v3129_v11  ;;  %2526 = vmatpush3.bf16.msra.mxu0 %v2525_v31  ;;  %v1657_v11 = vmul.f32 %v1651_v5, %v3166_v18  ;;  %v2835_v31 = vmov 0.0|0.0  }
 0x69c   : > { %2528 = vmatprep.subr.bf16.mxu0 %v2527_v39 }
 0x69d   : > { %v2529_v2 = vpack.c.bf16 %v1595_v20, %v1594_v25  ;;  %v1643_v34 = vpop.permute.xlu0 %1642  ;;  %v2539_v4 = vpack.c.bf16 %v1657_v11, %v1656_v1 }
 0x69e   : > { %v1647_v0 = vmul.f32 %v1643_v34, %v3155_v16  ;;  %v1641_v42 = vpop.permute.xlu1 %1640 }
 0x69f   : > { %v1646_v21 = vmul.f32 %v1641_v42, %v3155_v16  ;;  %2530 = vmatpush3.bf16.msra.mxu0 %v2529_v2  ;;  %v1616_v16 = vmul.f32 %v1609_v50, %v3136_v13 }
 0x6a0   : > { %2532 = vmatprep.subr.bf16.mxu0 %v2531_v41 }
 0x6a1   : > { %v2535_v44 = vpack.c.bf16 %v1647_v0, %v1646_v21  ;;  %v1603_v51 = vpop.permute.xlu0 %1602  ;;  %v2541_v23 = vpack.c.bf16 %v1617_v36, %v1616_v16 }
 0x6a2   : > { %v1607_v52 = vmul.f32 %v1603_v51, %v3120_v8  ;;  %v1601_v47 = vpop.permute.xlu1 %1600 }
 0x6a3   : > { %v1606_v35 = vmul.f32 %v1601_v47, %v3120_v8  ;;  %2534 = vmatpush3.bf16.msra.mxu0 %v2533_v48 }
 0x6a4   : > { %2536 = vmatprep.subr.bf16.mxu0 %v2535_v44 }
 0x6a5   : > { %v2537_v57 = vpack.c.bf16 %v1607_v52, %v1606_v35  ;;  %v1655_v45 = vpop.permute.xlu0 %1654 }
 0x6a6   : > { %v1659_v46 = vmul.f32 %v1655_v45, %v3166_v18  ;;  %v1653_v30 = vpop.permute.xlu1 %1652 }
 0x6a7   : > { %v1658_v61 = vmul.f32 %v1653_v30, %v3166_v18  ;;  %2538 = vmatpush3.bf16.msra.mxu0 %v2537_v57  ;;  %v1672_v18 = vld [vmem:[%s3850_s11] sm:$0xff] }
 0x6a8   : > { %2540 = vmatprep.subr.bf16.mxu0 %v2539_v4 }
 0x6a9   : > { %v2543_v28 = vpack.c.bf16 %v1659_v46, %v1658_v61  ;;  %v1615_v53 = vpop.permute.xlu0 %1614 }
 0x6aa   : > { %v1619_v8 = vmul.f32 %v1615_v53, %v3136_v13  ;;  %v1613_v43 = vpop.permute.xlu1 %1612 }
 0x6ab   : > { %v1618_v26 = vmul.f32 %v1613_v43, %v3136_v13  ;;  %2542 = vmatpush3.bf16.msra.mxu0 %v2541_v23 }
 0x6ac   : > { %2544 = vmatprep.subr.bf16.mxu0 %v2543_v28 }
 0x6ad   : > { %v2545_v5 = vpack.c.bf16 %v1619_v8, %v1618_v26  ;;  %v1663_v27 = vpop.permute.xlu0 %1662  ;;  %v1969_v26 = vld [vmem:[%s3852_s13] sm:$0xff] }
 0x6ae   : > { %v1669_v49 = vmul.f32 %v3646_v17, %v1663_v27  ;;  %v1661_v50 = vpop.permute.xlu1 %1660  ;;  %v1971_v27 = vld [vmem:[%s3852_s13 + $0x10] sm:$0xff] }
 0x6af   : > { %v1668_v62 = vmul.f32 %v3646_v17, %v1661_v50  ;;  %2546 = vmatpush3.bf16.msra.mxu0 %v2545_v5  ;;  %v1970_v5 = vld [vmem:[%s3852_s13 + $0x8] sm:$0xff] }
 0x6b1   : > { %v2547_v7 = vpack.c.bf16 %v1669_v49, %v1668_v62  ;;  %v1667_v13 = vpop.permute.xlu0 %1666  ;;  %v1972_v49 = vld [vmem:[%s3852_s13 + $0x18] sm:$0xff] }
 0x6b2   : > { %v1671_v6 = vmul.f32 %v3646_v17, %v1667_v13  ;;  %v1665_v55 = vpop.permute.xlu1 %1664  ;;  %1785 = vmatmul.mubr.f32.vlgmr.msra.gmra.mrb[16].mxu0 %v1672_v18  ;;  %v2565_v50 = vpack.c.bf16 %v1972_v49, %v1971_v27 }
 0x6b3   : > { %v1670_v38 = vmul.f32 %v3646_v17, %v1665_v55  ;;  %2548 = vmatprep.subr.bf16.mxu1 %v2547_v7  ;;  %1789 = vmatprep.mubr.f32.mxu0 %v1676_v32  ;;  %v1677_v17 = vld [vmem:[%s3850_s11 + $0x28] sm:$0xff]  ;;  %v1973_v32 = vld [vmem:[%s3879_s20] sm:$0x1] }
 0x6b4   : > { %2550 = vmatpush3.bf16.msra.mxu1 %v2547_v7 }
 0x6b5   : > { %v2551_v9 = vpack.c.bf16 %v1671_v6, %v1670_v38 }
 0x6b6   : > { %1790 = vmatmul.mubr.f32.gmra.mrb[18].mxu0 %v1675_v15 }
 0x6b7   : > { %2552 = vmatprep.subr.bf16.mxu1 %v2551_v9  ;;  %1794 = vmatprep.mubr.f32.mxu0 %v1679_v40 }
 0x6b8   : > { %2554 = vmatpush3.bf16.msra.mxu1 %v2551_v9 }
 0x6b9   : > { %2555 = vmatprep.subr.bf16.mxu1 %v2835_v31 }
 0x6ba   : > { %1795 = vmatmul.mubr.f32.gmra.mrb[20].mxu0 %v1678_v56 }
 0x6bb   : > { %2364 = vmatmul.mubr.msk.f32.vlgmr.msra.gmra.mrb[16].mxu1 %vm1385_vm10, %v1677_v17  ;;  %1799 = vmatprep.mubr.f32.mxu0 %v1682_v63 }
 0x6bc   : > { %2366 = vmatprep.mubr.msk.f32.mxu1 %vm1385_vm10, %v1680_v59 }
 0x6be   : > { %1800 = vmatmul.mubr.f32.gmra.mrb[22].mxu0 %v1681_v60 }
 0x6bf   : > { %2367 = vmatmul.mubr.msk.f32.gmra.mrb[18].mxu1 %vm1385_vm10, %v1683_v24 }
 0x6c0   : > { %2377 = vmatprep.mubr.msk.f32.mxu1 %vm2836_vm11, %v2825_v19 }
 0x6c2   : > { %v1696_v33 = vpop.permute.xlu0 %1695 }
 0x6c3   : > { %v1691_v20 = vpop.permute.xlu1 %1690 }
 0x6c6   : > { %v1706_v4 = vpop.permute.xlu0 %1705 }
 0x6c7   : > { %v1701_v44 = vpop.permute.xlu1 %1700 }
 0x785   : > { %v2311_v39 = vpop.f32.mrb[16].mxu0 }
 0x786   : > { %v2312_v29 = vpop.f32.mrb[17].mxu0 }
 0x787   : > { %v2313_v12 = vadd.f32 %v2312_v29, %v2311_v39 }
 0x789   : > { %v2314_v10 = vpop.f32.mrb[18].mxu0  ;;  %v1787_v0 = vadd.f32 %v2313_v12, %v1691_v20 }
 0x78a   : > { %v2315_v37 = vpop.f32.mrb[19].mxu0 }
 0x78b   : > { %v2316_v25 = vadd.f32 %v2315_v37, %v2314_v10 }
 0x78d   : > { %v2317_v14 = vpop.f32.mrb[20].mxu0  ;;  %v1792_v2 = vadd.f32 %v2316_v25, %v1696_v33 }
 0x78e   : > { %v2318_v34 = vpop.f32.mrb[21].mxu0  ;;  %v2365_v41 = vpop.f32.mrb[16].mxu1 }
 0x78f   : > { %v2319_v42 = vadd.f32 %v2318_v34, %v2317_v14  ;;  %v1877_v21 = vadd.f32 %v2365_v41, %v1792_v2  ;;  %v1871_v48 = vpop.f32.mrb[17].mxu1 }
 0x790   : > { %v1872_v51 = vadd.f32 %v1871_v48, %v1787_v0 }
 0x791   : > { %v1891_v11 = vadd.f32 %v3523_v54, %v1877_v21  ;;  %v2320_v1 = vpop.f32.mrb[22].mxu0  ;;  %v1797_v52 = vadd.f32 %v2319_v42, %v1701_v44 }
 0x792   : > { %v1890_v47 = vadd.f32 %v3515_v22, %v1872_v51  ;;  %v2321_v35 = vpop.f32.mrb[23].mxu0  ;;  %v2368_v36 = vpop.f32.mrb[18].mxu1 }
 0x793   : > { %v1895_v16 = vmax.f32 %v1891_v11, 0.0  ;;  %v2322_v57 = vadd.f32 %v2321_v35, %v2320_v1  ;;  %v1881_v45 = vpop.f32.mrb[19].mxu1 }
 0x794   : > { %v1894_v46 = vmax.f32 %v1890_v47, 0.0  ;;  %v1882_v30 = vadd.f32 %v1881_v45, %v1797_v52 }
 0x795   : > { %v1802_v61 = vadd.f32 %v2322_v57, %v1706_v4 }
 0x796   : > { %v2556_v23 = vpack.c.bf16 %v1895_v16, %v1894_v46  ;;  %v1892_v53 = vadd.f32 %v3533_v58, %v1882_v30  ;;  %v1898_v58 = vld [vmem:[%s3878_s14] sm:$0x1] }
 0x797   : > { %v1887_v28 = vadd.f32 %v2368_v36, %v1802_v61 }
 0x798   : > { %2557 = vmatpush3.bf16.xpose.msra.mxu1 %v2556_v23  ;;  %v1896_v43 = vmax.f32 %v1892_v53, 0.0 }
 0x799   : > { %v1893_v54 = vadd.f32 %v3539_v3, %v1887_v28  ;;  %2558 = vmatprep.subr.bf16.mxu1 %v2835_v31  ;;  %v2562_v3 = vpack.c.bf16 %v1970_v5, %v1969_v26 }
 0x79b   : > { %v1897_v8 = vmax.f32 %v1893_v54, 0.0 }
 0x79d   : > { %v2559_v22 = vpack.c.bf16 %v1897_v8, %v1896_v43 }
 0x7a0   : > { %2560 = vmatpush3.bf16.xpose.msra.mxu1 %v2559_v22 }
 0x7a1   : > { %2561 = vmatprep.subr.bf16.mxu1 %v2835_v31 }
 0x7a7   : > { %2378 = vmatmul.mubr.f32.vlgmr.msra.gmra.mrb[20].mxu1 %v1898_v58 }
 0x7a8   : > { %2563 = vmatpush3.bf16.msra.mxu1 %v2562_v3  ;;  %2388 = vmatprep.mubr.msk.f32.mxu1 %vm2836_vm11, %v2825_v19 }
 0x7a9   : > { %2564 = vmatprep.subr.bf16.mxu1 %v2835_v31 }
 0x7ac   : > { %2566 = vmatpush3.bf16.msra.mxu1 %v2565_v50 }
 0x87a   : > { %v1965_v62 = vpop.f32.mrb[20].mxu1 }
 0x87b   : > { %v2379_v18 = vpop.f32.mrb[21].mxu1  ;;  %2389 = vmatmul.mubr.msk.f32.vlgmr.msra.gmra.mrb[22].mxu1 %vm1385_vm10, %v1965_v62 }
 0x94e   : > { %v2043_v7 = vpop.f32.mrb[22].mxu1 }
 0x94f   : > { %v2044_v13 = vadd.f32 %v2043_v7, %v1973_v32  ;;  %v2390_v6 = vpop.f32.mrb[23].mxu1 }
 0x951   : > { %2047 = vst [vmem:[%s563_s25] sm:$0x1] %v2044_v13 }
 0x952 PF: > { %s3881_s19 = sld [smem:[#allocation13_spill]] }
 0x958   : > { %s28_s18 = sadd.s32 1, %s3881_s19  }
 0x959   : > { %p25_p6 = scmp.ge.s32.totalorder %s28_s18, 4  }
 0x95b   :  { %27 = sbr.rel (!%p25_p6) target bundleno = 7 (0x7), region = 131 }
 0x962   :  { %2065 = vsyncpa [#allocation3], 1 }
 0x963   :  { %2067 = vsyncpa [#allocation3 + $0x1], 1 }
 0x964   :  { %2068 = vsyncpa [#allocation5], 1 }
 0x965   :  { %2069 = vsyncpa [#allocation8], 1 }

</bundles_post_ra>
